<compile_context>
chip_gen: v5e
topology: v5e:2x2
jax: 0.10.0
libtpu: 0.0.40
codegen_flags: <defaults>
</compile_context>

<pallas_src>
import functools

import jax
import jax.numpy as jnp
from jax.experimental import pallas as pl
from jax.experimental.pallas import tpu as pltpu

C_IN = 2048        # flatten(resnet_layer(x)) feature size
N_FC = 101         # fc:  Linear(2048, 101)
N_FC1 = 1          # fc1: Linear(2048, 1)
N_TOTAL = N_FC + N_FC1
N_PAD = 128        # pad combined head output to a full lane width


def _baseline_kernel(x_ref, w_ref, b_ref, y_ref, out_ref, *, inv_hw):
    """One grid step processes a TB-row slice of the batch.

    x_ref:  (TB, HW, C)   lane-dense activations (channels on the lane axis)
    w_ref:  (C, N_PAD)    fused (fc | fc1) weight, resident across the grid
    b_ref:  (1, N_PAD)    fused bias, resident
    y_ref:  (TB, C)       flattened pooled features y (float32)
    out_ref:(TB, N_PAD)   fused head logits (float32)
    """
    # Upcast after the DMA (supports bf16 activation streaming with no extra
    # wrapper pass); pool accumulates in f32.
    x = x_ref[...].astype(jnp.float32)               # (TB, HW, C)
    # Global average pool: sum over spatial axis * compile-time 1/HW
    # (VPU mul, no divide on the critical path).
    y = jnp.sum(x, axis=1) * inv_hw                  # (TB, C)
    y_ref[...] = y
    # Single MXU matmul against the fused head weight, bias added in-kernel.
    out_ref[...] = (
        jnp.dot(y, w_ref[...], preferred_element_type=jnp.float32) + b_ref[...]
    )


def fuse_head_params(w_fc, b_fc, w_fc1, b_fc1):
    """Fuse fc and fc1 into one (2048, 128) weight + (1, 128) bias.

    Call ONCE at setup time (not per forward) — this is the hoisted
    transpose/concat/pad of the 1 MiB head weight.
    """
    w = jnp.concatenate([w_fc.T, w_fc1.T], axis=1)                 # (2048, 102)
    w = jnp.pad(w, ((0, 0), (0, N_PAD - N_TOTAL))).astype(jnp.float32)
    b = jnp.concatenate([b_fc, b_fc1], axis=0)                     # (102,)
    b = jnp.pad(b, (0, N_PAD - N_TOTAL)).reshape(1, N_PAD).astype(jnp.float32)
    return w, b


def _pick_batch_tile(batch, hw, itemsize, x_budget_bytes=24 << 20):
    """Largest batch tile whose double-buffered x stream fits the budget.

    Rounded to a multiple of 8 (sublane alignment of the (TB, C) output block)
    unless a single tile covers the whole batch.  For batches >= 16 the tile is
    capped at ceil(B/2) so the v7x megacore split has >= 2 grid steps.
    """
    row_bytes = hw * C_IN * itemsize
    tb = max(1, x_budget_bytes // (2 * row_bytes))
    if batch >= 16:
        tb = min(tb, pl.cdiv(batch, 2))
    if tb >= batch:
        return batch                       # one tile == full batch extent
    tb = max(8, (tb // 8) * 8)
    return min(tb, batch)


def baseline_forward(x, w_comb, b_comb, *, batch_tile=None,
                     vmem_limit_bytes=48 << 20):
    """Pallas implementation of baseline.forward (post-conv-stack part).

    x: (B, H, W, C) or (B, HW, C), channels-LAST (C=2048 on the lane axis),
       float32 or bfloat16 — the output of the backbone's conv stack in the
       natural XLA-TPU layout (no relayout pass is performed here).
    w_comb, b_comb: precomputed by `fuse_head_params`.
    Returns ([x1, x2], y) matching the PyTorch module:
      x1: (B, 101), x2: (B, 1), y: (B, 2048) float32.
    """
    if x.ndim == 4:
        B, H, W, C = x.shape
        x = x.reshape(B, H * W, C)        # adjacent-dim merge: no data movement
    B, HW, C = x.shape
    assert C == C_IN

    TB = batch_tile if batch_tile is not None else _pick_batch_tile(
        B, HW, jnp.dtype(x.dtype).itemsize)
    TB = min(TB, B)
    n_tiles = pl.cdiv(B, TB)              # ragged last block handled by Pallas

    kernel = functools.partial(_baseline_kernel, inv_hw=1.0 / HW)

    y_flat, logits = pl.pallas_call(
        kernel,
        out_shape=(
            jax.ShapeDtypeStruct((B, C), jnp.float32),        # y
            jax.ShapeDtypeStruct((B, N_PAD), jnp.float32),    # fused logits
        ),
        grid_spec=pltpu.PrefetchScalarGridSpec(
            num_scalar_prefetch=0,
            grid=(n_tiles,),
            in_specs=[
                pl.BlockSpec((TB, HW, C), lambda b: (b, 0, 0)),   # x batch tile
                pl.BlockSpec((C, N_PAD), lambda b: (0, 0)),       # weight (resident)
                pl.BlockSpec((1, N_PAD), lambda b: (0, 0)),       # bias (resident)
            ],
            out_specs=[
                pl.BlockSpec((TB, C), lambda b: (b, 0)),          # y tile
                pl.BlockSpec((TB, N_PAD), lambda b: (b, 0)),      # logits tile
            ],
        ),
        compiler_params=pltpu.CompilerParams(
            dimension_semantics=("parallel",),        # megacore split on v7x
            vmem_limit_bytes=vmem_limit_bytes,        # above 16/32 MiB scoped
        ),                                            # defaults, < v7x 64 MiB
    )(x, w_comb, b_comb)

    x1 = logits[:, :N_FC]                  # fc  head: (B, 101)
    x2 = logits[:, N_FC:N_TOTAL]           # fc1 head: (B, 1)
    return [x1, x2], y_flat


def _reference(x_bhwc, w_fc, b_fc, w_fc1, b_fc1):
    """Pure-JAX reference mirroring the PyTorch forward (channels-last x)."""
    y = jnp.mean(x_bhwc.astype(jnp.float32), axis=(1, 2))   # avg-pool + flatten
    x1 = y @ w_fc.T + b_fc
    x2 = y @ w_fc1.T + b_fc1
    return [x1, x2], y


if __name__ == "__main__":
    key = jax.random.PRNGKey(0)
    k_x, k_x2, k_wfc, k_bfc, k_wfc1, k_bfc1 = jax.random.split(key, 6)

    # Small spatial extent; channel count is fixed at 2048 by the fc layers.
    B, H, W = 2, 4, 4
    x = jax.random.normal(k_x, (B, H, W, C_IN), dtype=jnp.float32)  # NHWC

    # Deterministic parameter init (nn.Linear-like uniform bound 1/sqrt(fan_in)).
    bound = 1.0 / jnp.sqrt(jnp.float32(C_IN))
    w_fc = jax.random.uniform(k_wfc, (N_FC, C_IN), jnp.float32, -bound, bound)
    b_fc = jax.random.uniform(k_bfc, (N_FC,), jnp.float32, -bound, bound)
    w_fc1 = jax.random.uniform(k_wfc1, (N_FC1, C_IN), jnp.float32, -bound, bound)
    b_fc1 = jax.random.uniform(k_bfc1, (N_FC1,), jnp.float32, -bound, bound)

    # Hoisted once out of the forward path.
    w_comb, b_comb = fuse_head_params(w_fc, b_fc, w_fc1, b_fc1)

    (x1, x2), y = baseline_forward(x, w_comb, b_comb)
    jax.block_until_ready((x1, x2, y))

    (x1_r, x2_r), y_r = _reference(x, w_fc, b_fc, w_fc1, b_fc1)
    assert x1.shape == (B, N_FC) and x2.shape == (B, N_FC1) and y.shape == (B, C_IN)
    assert jnp.allclose(y, y_r, atol=1e-5, rtol=1e-5)
    assert jnp.allclose(x1, x1_r, atol=1e-4, rtol=1e-4)
    assert jnp.allclose(x2, x2_r, atol=1e-4, rtol=1e-4)

    # Ragged-batch path (no wrapper jnp.pad): B not a multiple of the tile.
    B2, H2, W2 = 10, 2, 2
    xr = jax.random.normal(k_x2, (B2, H2, W2, C_IN), dtype=jnp.float32)
    (r1, r2), yr = baseline_forward(xr, w_comb, b_comb, batch_tile=8)
    jax.block_until_ready((r1, r2, yr))
    (r1_ref, r2_ref), yr_ref = _reference(xr, w_fc, b_fc, w_fc1, b_fc1)
    assert r1.shape == (B2, N_FC) and r2.shape == (B2, N_FC1) and yr.shape == (B2, C_IN)
    assert jnp.allclose(yr, yr_ref, atol=1e-5, rtol=1e-5)
    assert jnp.allclose(r1, r1_ref, atol=1e-4, rtol=1e-4)
    assert jnp.allclose(r2, r2_ref, atol=1e-4, rtol=1e-4)

    print("KERNEL_OK")
</pallas_src>

<mosaic_0001>
module attributes {stable_mosaic.version = 11 : i64} {
  func.func @_baseline_kernel(%arg0: i32, %arg1: memref<2x16x2048xf32, #tpu.memory_space<vmem>>, %arg2: memref<2048x128xf32, #tpu.memory_space<vmem>>, %arg3: memref<1x128xf32, #tpu.memory_space<vmem>>, %arg4: memref<2x2048xf32, #tpu.memory_space<vmem>>, %arg5: memref<2x128xf32, #tpu.memory_space<vmem>>) attributes {dimension_semantics = [#tpu.dimension_semantics<parallel>], iteration_bounds = array<i64: 1>, scalar_prefetch = 0 : i64, scratch_operands = 0 : i64, tpu.core_type = #tpu.core_type<tc>, window_params = [{transform_indices = @transform_0, window_bounds = array<i64: 2, 16, 2048>}, {pipeline_mode = #tpu.pipeline_mode<synchronous>, transform_indices = @transform_1, window_bounds = array<i64: 2048, 128>}, {pipeline_mode = #tpu.pipeline_mode<synchronous>, transform_indices = @transform_2, window_bounds = array<i64: 1, 128>}, {transform_indices = @transform_3, window_bounds = array<i64: 2, 2048>}, {transform_indices = @transform_4, window_bounds = array<i64: 2, 128>}]} {
    %c0 = arith.constant 0 : index
    %c0_0 = arith.constant 0 : index
    %c0_1 = arith.constant 0 : index
    %0 = vector.load %arg1[%c0, %c0_0, %c0_1] : memref<2x16x2048xf32, #tpu.memory_space<vmem>>, vector<2x16x2048xf32>
    %cst = arith.constant dense<0.000000e+00> : vector<2x2048xf32>
    %1 = vector.multi_reduction <add>, %0, %cst [1] : vector<2x16x2048xf32> to vector<2x2048xf32>
    %cst_2 = arith.constant 6.250000e-02 : f32
    %2 = vector.broadcast %cst_2 : f32 to vector<2x2048xf32>
    %3 = arith.mulf %1, %2 : vector<2x2048xf32>
    %c0_3 = arith.constant 0 : index
    %c0_4 = arith.constant 0 : index
    %4 = vector.load %arg4[%c0_3, %c0_4] : memref<2x2048xf32, #tpu.memory_space<vmem>>, vector<2x2048xf32>
    tpu.vector_store %arg4[%c0_3, %c0_4], %3 {strides = array<i32>} : memref<2x2048xf32, #tpu.memory_space<vmem>>, vector<2x2048xf32>,
    %c0_5 = arith.constant 0 : index
    %c0_6 = arith.constant 0 : index
    %5 = vector.load %arg2[%c0_5, %c0_6] : memref<2048x128xf32, #tpu.memory_space<vmem>>, vector<2048x128xf32>
    %cst_7 = arith.constant dense<0.000000e+00> : vector<2x128xf32>
    %6 = tpu.matmul %3, %5, %cst_7 {dimension_numbers = #tpu.dot_dimension_numbers<[1], [0], [0], [1], [0, 0, 1, 1], [], []>} : vector<2x2048xf32>, vector<2048x128xf32>, vector<2x128xf32> -> vector<2x128xf32>
    %c0_8 = arith.constant 0 : index
    %c0_9 = arith.constant 0 : index
    %7 = vector.load %arg3[%c0_8, %c0_9] : memref<1x128xf32, #tpu.memory_space<vmem>>, vector<1x128xf32>
    %8 = vector.broadcast %7 : vector<1x128xf32> to vector<2x128xf32>
    %9 = arith.addf %6, %8 : vector<2x128xf32>
    %c0_10 = arith.constant 0 : index
    %c0_11 = arith.constant 0 : index
    %10 = vector.load %arg5[%c0_10, %c0_11] : memref<2x128xf32, #tpu.memory_space<vmem>>, vector<2x128xf32>
    tpu.vector_store %arg5[%c0_10, %c0_11], %9 {strides = array<i32>} : memref<2x128xf32, #tpu.memory_space<vmem>>, vector<2x128xf32>,
    return
  }
  func.func @transform_0(%arg0: i32) -> (i32, i32, i32) {
    %c0_i32 = arith.constant 0 : i32
    %c0_i32_0 = arith.constant 0 : i32
    %c0_i32_1 = arith.constant 0 : i32
    return %arg0, %c0_i32, %c0_i32_0 : i32, i32, i32
  }
  func.func @transform_1(%arg0: i32) -> (i32, i32) {
    %c0_i32 = arith.constant 0 : i32
    %c0_i32_0 = arith.constant 0 : i32
    %c0_i32_1 = arith.constant 0 : i32
    return %c0_i32, %c0_i32_0 : i32, i32
  }
  func.func @transform_2(%arg0: i32) -> (i32, i32) {
    %c0_i32 = arith.constant 0 : i32
    %c0_i32_0 = arith.constant 0 : i32
    %c0_i32_1 = arith.constant 0 : i32
    return %c0_i32, %c0_i32_0 : i32, i32
  }
  func.func @transform_3(%arg0: i32) -> (i32, i32) {
    %c0_i32 = arith.constant 0 : i32
    %c0_i32_0 = arith.constant 0 : i32
    return %arg0, %c0_i32 : i32, i32
  }
  func.func @transform_4(%arg0: i32) -> (i32, i32) {
    %c0_i32 = arith.constant 0 : i32
    %c0_i32_0 = arith.constant 0 : i32
    return %arg0, %c0_i32 : i32, i32
  }
}

</mosaic_0001>

<bundles_post_ra>
// kernel: tpu_custom_call.1
= control target key start
LH: loop header
LB: loop body
LE: loop exit
PB: predicated region body
PF: predicated region fallthrough
CT: control target
= control target key end

     0   :  { %10 = vsyncpa [#allocation3], 0  ;;  %s1426_s0 = inlined_call_operand.hbm [shape: f32[2,16,2048], index: 0, kind: input, shape index: {}]   ;;  %s1427_s1 = inlined_call_operand.hbm [shape: f32[2048,128], index: 1, kind: input, shape index: {}]   ;;  %s1428_s2 = inlined_call_operand.vmem [shape: f32[1,128], index: 2, kind: input, shape index: {}]   ;;  %s1429_s3 = inlined_call_operand.hbm [shape: f32[2,2048], index: 3, kind: output, shape index: {0}]   ;;  %s1430_s4 = inlined_call_operand.hbm [shape: f32[2,128], index: 4, kind: output, shape index: {1}]  }
   0x1   :  { %11 = vsyncpa [#allocation6], 0 }
   0x2   :  { %12 = vsyncpa [#allocation4], 0 }
   0x3   :  { %13 = vsyncpa [#allocation9], 0  ;;  %s18_s17 = sshll.u32 %s1426_s0, 4  ;;  %s1254_s18 = smov [#allocation2]   ;;  %s19_s17 = int_to_ptr.hbm [resolvable:$true] %s18_s17 }
   0x4   :  { %s20_s19 = sshll.u32 %s1254_s18, 4  ;;  %s31_s22 = sshll.u32 %s1427_s1, 4  ;;  %s21_s19 = int_to_ptr.vmem [resolvable:$true] %s20_s19  ;;  %s32_s22 = int_to_ptr.hbm [resolvable:$true] %s31_s22 }
   0x5   :  { %s1255_s23 = smov 2048   ;;  %s1256_s24 = smov 128  }
   0x6   :  { %26 = dma.hbm_to_vmem [thread:$0]  %s19_s17, 8192, %s21_s19, [#allocation3], %s1255_s23, %s1255_s23, %s1256_s24  }
   0x7   :  { %s1257_s25 = smov [#allocation5]   ;;  %s1258_s27 = smov 8  }
   0x8   :  { %s33_s26 = sshll.u32 %s1257_s25, 4  ;;  %s34_s26 = int_to_ptr.vmem [resolvable:$true] %s33_s26 }
   0x9   :  { %39 = dma.hbm_to_vmem [thread:$0]  %s32_s22, 32768, %s34_s26, [#allocation6], %s1256_s24, %s1256_s24, %s1258_s27  }
   0xa   :  { %1246 = dma.done.wait [#allocation3], 8192  }
   0xb   :  { %1247 = vsyncadd [#allocation3], 4294959104 }
   0xc   :  { %1248 = dma.done.wait [#allocation6], 32768  }
   0xd   :  { %1249 = vsyncadd [#allocation6], 4294934528  ;;  %v510_v0 = vld [vmem:[#allocation5 + $0x78] sm:$0xff]  ;;  %v509_v2 = vld [vmem:[#allocation5 + $0x70] sm:$0xff]  ;;  %vm458_vm0 = vcmask 1041409   ;;  %vm426_vm1 = vcmask 1041408  }
   0xe   :  { %v542_v1 = vld [vmem:[#allocation5 + $0x178] sm:$0xff]  ;;  %787 = vmatpush.msra.mxu0 %v510_v0  ;;  %v541_v4 = vld [vmem:[#allocation5 + $0x170] sm:$0xff]  ;;  %v508_v6 = vld [vmem:[#allocation5 + $0x68] sm:$0xff]  ;;  %vm428_vm2 = vcmask 1045508   ;;  %vm430_vm3 = vcmask 1043456   ;;  %vm460_vm4 = vcmask 1043459  }
   0xf   :  { %827 = vmatpush.msra.mxu2 %v542_v1  ;;  %v526_v3 = vld [vmem:[#allocation5 + $0xf8] sm:$0xff]  ;;  %v525_v7 = vld [vmem:[#allocation5 + $0xf0] sm:$0xff]  ;;  %v540_v8 = vld [vmem:[#allocation5 + $0x168] sm:$0xff]  ;;  %vm462_vm5 = vcmask 1045509   ;;  %vm464_vm6 = vcmask 1047559   ;;  %s1115_s5 = sshll.u32 %s1429_s3, 4  ;;  %s1116_s5 = int_to_ptr.hbm [resolvable:$true] %s1115_s5 }
  0x10   :  { %v558_v5 = vld [vmem:[#allocation5 + $0x1f8] sm:$0xff]  ;;  %807 = vmatpush.msra.mxu1 %v526_v3  ;;  %788 = vmatpush.msra.mxu0 %v509_v2  ;;  %v557_v9 = vld [vmem:[#allocation5 + $0x1f0] sm:$0xff]  ;;  %v524_v10 = vld [vmem:[#allocation5 + $0xe8] sm:$0xff]  ;;  %s1260_s3 = smov [#allocation8]   ;;  %s1126_s9 = sshll.u32 %s1430_s4, 4  ;;  %s1127_s9 = int_to_ptr.hbm [resolvable:$true] %s1126_s9 }
  0x11   :  { %847 = vmatpush.msra.mxu3 %v558_v5  ;;  %828 = vmatpush.msra.mxu2 %v541_v4  ;;  %v507_v11 = vld [vmem:[#allocation5 + $0x60] sm:$0xff]  ;;  %v556_v13 = vld [vmem:[#allocation5 + $0x1e8] sm:$0xff]  ;;  %v506_v16 = vld [vmem:[#allocation5 + $0x58] sm:$0xff]  ;;  %s1124_s6 = sshll.u32 %s1260_s3, 4  ;;  %s1125_s6 = int_to_ptr.vmem [resolvable:$true] %s1124_s6 }
  0x12   :  { %808 = vmatpush.msra.mxu1 %v525_v7  ;;  %v539_v12 = vld [vmem:[#allocation5 + $0x160] sm:$0xff]  ;;  %789 = vmatpush.msra.mxu0 %v508_v6  ;;  %v538_v17 = vld [vmem:[#allocation5 + $0x158] sm:$0xff]  ;;  %v505_v20 = vld [vmem:[#allocation5 + $0x50] sm:$0xff] }
  0x13   :  { %848 = vmatpush.msra.mxu3 %v557_v9  ;;  %829 = vmatpush.msra.mxu2 %v540_v8  ;;  %v523_v14 = vld [vmem:[#allocation5 + $0xe0] sm:$0xff]  ;;  %v522_v18 = vld [vmem:[#allocation5 + $0xd8] sm:$0xff]  ;;  %v537_v21 = vld [vmem:[#allocation5 + $0x150] sm:$0xff] }
  0x14   :  { %v555_v15 = vld [vmem:[#allocation5 + $0x1e0] sm:$0xff]  ;;  %809 = vmatpush.msra.mxu1 %v524_v10  ;;  %790 = vmatpush.msra.mxu0 %v507_v11  ;;  %v554_v19 = vld [vmem:[#allocation5 + $0x1d8] sm:$0xff]  ;;  %v521_v22 = vld [vmem:[#allocation5 + $0xd0] sm:$0xff] }
  0x15   :  { %849 = vmatpush.msra.mxu3 %v556_v13  ;;  %830 = vmatpush.msra.mxu2 %v539_v12  ;;  %v553_v23 = vld [vmem:[#allocation5 + $0x1d0] sm:$0xff]  ;;  %v504_v24 = vld [vmem:[#allocation5 + $0x48] sm:$0xff]  ;;  %v503_v28 = vld [vmem:[#allocation5 + $0x40] sm:$0xff] }
  0x16   :  { %810 = vmatpush.msra.mxu1 %v523_v14  ;;  %791 = vmatpush.msra.mxu0 %v506_v16  ;;  %v536_v25 = vld [vmem:[#allocation5 + $0x148] sm:$0xff]  ;;  %v535_v29 = vld [vmem:[#allocation5 + $0x140] sm:$0xff]  ;;  %v502_v32 = vld [vmem:[#allocation5 + $0x38] sm:$0xff] }
  0x17   :  { %850 = vmatpush.msra.mxu3 %v555_v15  ;;  %831 = vmatpush.msra.mxu2 %v538_v17  ;;  %v520_v26 = vld [vmem:[#allocation5 + $0xc8] sm:$0xff]  ;;  %v519_v30 = vld [vmem:[#allocation5 + $0xc0] sm:$0xff]  ;;  %v534_v33 = vld [vmem:[#allocation5 + $0x138] sm:$0xff] }
  0x18   :  { %811 = vmatpush.msra.mxu1 %v522_v18  ;;  %792 = vmatpush.msra.mxu0 %v505_v20  ;;  %v552_v27 = vld [vmem:[#allocation5 + $0x1c8] sm:$0xff]  ;;  %v551_v31 = vld [vmem:[#allocation5 + $0x1c0] sm:$0xff]  ;;  %v518_v34 = vld [vmem:[#allocation5 + $0xb8] sm:$0xff] }
  0x19   :  { %851 = vmatpush.msra.mxu3 %v554_v19  ;;  %832 = vmatpush.msra.mxu2 %v537_v21  ;;  %v550_v35 = vld [vmem:[#allocation5 + $0x1b8] sm:$0xff]  ;;  %v501_v36 = vld [vmem:[#allocation5 + $0x30] sm:$0xff]  ;;  %v500_v40 = vld [vmem:[#allocation5 + $0x28] sm:$0xff] }
  0x1a   :  { %812 = vmatpush.msra.mxu1 %v521_v22  ;;  %793 = vmatpush.msra.mxu0 %v504_v24  ;;  %v533_v37 = vld [vmem:[#allocation5 + $0x130] sm:$0xff]  ;;  %v532_v41 = vld [vmem:[#allocation5 + $0x128] sm:$0xff]  ;;  %v499_v44 = vld [vmem:[#allocation5 + $0x20] sm:$0xff] }
  0x1b   :  { %852 = vmatpush.msra.mxu3 %v553_v23  ;;  %833 = vmatpush.msra.mxu2 %v536_v25  ;;  %v517_v38 = vld [vmem:[#allocation5 + $0xb0] sm:$0xff]  ;;  %v516_v42 = vld [vmem:[#allocation5 + $0xa8] sm:$0xff]  ;;  %v531_v45 = vld [vmem:[#allocation5 + $0x120] sm:$0xff] }
  0x1c   :  { %813 = vmatpush.msra.mxu1 %v520_v26  ;;  %794 = vmatpush.msra.mxu0 %v503_v28  ;;  %v549_v39 = vld [vmem:[#allocation5 + $0x1b0] sm:$0xff]  ;;  %v548_v43 = vld [vmem:[#allocation5 + $0x1a8] sm:$0xff]  ;;  %v515_v46 = vld [vmem:[#allocation5 + $0xa0] sm:$0xff] }
  0x1d   :  { %853 = vmatpush.msra.mxu3 %v552_v27  ;;  %834 = vmatpush.msra.mxu2 %v535_v29  ;;  %v547_v47 = vld [vmem:[#allocation5 + $0x1a0] sm:$0xff]  ;;  %v498_v48 = vld [vmem:[#allocation5 + $0x18] sm:$0xff]  ;;  %v497_v52 = vld [vmem:[#allocation5 + $0x10] sm:$0xff] }
  0x1e   :  { %814 = vmatpush.msra.mxu1 %v519_v30  ;;  %795 = vmatpush.msra.mxu0 %v502_v32  ;;  %v530_v49 = vld [vmem:[#allocation5 + $0x118] sm:$0xff]  ;;  %v529_v53 = vld [vmem:[#allocation5 + $0x110] sm:$0xff]  ;;  %v496_v56 = vld [vmem:[#allocation5 + $0x8] sm:$0xff] }
  0x1f   :  { %854 = vmatpush.msra.mxu3 %v551_v31  ;;  %835 = vmatpush.msra.mxu2 %v534_v33  ;;  %v514_v50 = vld [vmem:[#allocation5 + $0x98] sm:$0xff]  ;;  %v513_v54 = vld [vmem:[#allocation5 + $0x90] sm:$0xff]  ;;  %v528_v57 = vld [vmem:[#allocation5 + $0x108] sm:$0xff] }
  0x20   :  { %815 = vmatpush.msra.mxu1 %v518_v34  ;;  %796 = vmatpush.msra.mxu0 %v501_v36  ;;  %v546_v51 = vld [vmem:[#allocation5 + $0x198] sm:$0xff]  ;;  %v545_v55 = vld [vmem:[#allocation5 + $0x190] sm:$0xff]  ;;  %v512_v58 = vld [vmem:[#allocation5 + $0x88] sm:$0xff] }
  0x21   :  { %855 = vmatpush.msra.mxu3 %v550_v35  ;;  %836 = vmatpush.msra.mxu2 %v533_v37  ;;  %v544_v59 = vld [vmem:[#allocation5 + $0x188] sm:$0xff]  ;;  %v495_v60 = vld [vmem:[#allocation5] sm:$0xff]  ;;  %v574_v62 = vld [vmem:[#allocation5 + $0x278] sm:$0xff] }
  0x22   :  { %816 = vmatpush.msra.mxu1 %v517_v38  ;;  %797 = vmatpush.msra.mxu0 %v500_v40  ;;  %v527_v61 = vld [vmem:[#allocation5 + $0x100] sm:$0xff]  ;;  %v606_v63 = vld [vmem:[#allocation5 + $0x378] sm:$0xff]  ;;  %v573_v2 = vld [vmem:[#allocation5 + $0x270] sm:$0xff] }
  0x23   :  { %856 = vmatpush.msra.mxu3 %v549_v39  ;;  %837 = vmatpush.msra.mxu2 %v532_v41  ;;  %v511_v0 = vld [vmem:[#allocation5 + $0x80] sm:$0xff]  ;;  %v590_v3 = vld [vmem:[#allocation5 + $0x2f8] sm:$0xff]  ;;  %v605_v4 = vld [vmem:[#allocation5 + $0x370] sm:$0xff] }
  0x24   :  { %817 = vmatpush.msra.mxu1 %v516_v42  ;;  %798 = vmatpush.msra.mxu0 %v499_v44  ;;  %v543_v1 = vld [vmem:[#allocation5 + $0x180] sm:$0xff]  ;;  %v622_v5 = vld [vmem:[#allocation5 + $0x3f8] sm:$0xff]  ;;  %v572_v6 = vld [vmem:[#allocation5 + $0x268] sm:$0xff] }
  0x25   :  { %857 = vmatpush.msra.mxu3 %v548_v43  ;;  %838 = vmatpush.msra.mxu2 %v531_v45  ;;  %v589_v7 = vld [vmem:[#allocation5 + $0x2f0] sm:$0xff]  ;;  %v604_v8 = vld [vmem:[#allocation5 + $0x368] sm:$0xff]  ;;  %v571_v10 = vld [vmem:[#allocation5 + $0x260] sm:$0xff] }
  0x26   :  { %818 = vmatpush.msra.mxu1 %v515_v46  ;;  %799 = vmatpush.msra.mxu0 %v498_v48  ;;  %v621_v9 = vld [vmem:[#allocation5 + $0x3f0] sm:$0xff]  ;;  %v588_v11 = vld [vmem:[#allocation5 + $0x2e8] sm:$0xff]  ;;  %v603_v12 = vld [vmem:[#allocation5 + $0x360] sm:$0xff] }
  0x27   :  { %858 = vmatpush.msra.mxu3 %v547_v47  ;;  %839 = vmatpush.msra.mxu2 %v530_v49  ;;  %v620_v13 = vld [vmem:[#allocation5 + $0x3e8] sm:$0xff]  ;;  %v570_v14 = vld [vmem:[#allocation5 + $0x258] sm:$0xff]  ;;  %v587_v15 = vld [vmem:[#allocation5 + $0x2e0] sm:$0xff] }
  0x28   :  { %819 = vmatpush.msra.mxu1 %v514_v50  ;;  %800 = vmatpush.msra.mxu0 %v497_v52  ;;  %v602_v16 = vld [vmem:[#allocation5 + $0x358] sm:$0xff]  ;;  %v619_v17 = vld [vmem:[#allocation5 + $0x3e0] sm:$0xff]  ;;  %v569_v18 = vld [vmem:[#allocation5 + $0x250] sm:$0xff] }
  0x29   :  { %859 = vmatpush.msra.mxu3 %v546_v51  ;;  %840 = vmatpush.msra.mxu2 %v529_v53  ;;  %v586_v19 = vld [vmem:[#allocation5 + $0x2d8] sm:$0xff]  ;;  %v601_v20 = vld [vmem:[#allocation5 + $0x350] sm:$0xff]  ;;  %v568_v22 = vld [vmem:[#allocation5 + $0x248] sm:$0xff] }
  0x2a   :  { %820 = vmatpush.msra.mxu1 %v513_v54  ;;  %801 = vmatpush.msra.mxu0 %v496_v56  ;;  %v618_v21 = vld [vmem:[#allocation5 + $0x3d8] sm:$0xff]  ;;  %v585_v23 = vld [vmem:[#allocation5 + $0x2d0] sm:$0xff]  ;;  %v600_v24 = vld [vmem:[#allocation5 + $0x348] sm:$0xff] }
  0x2b   :  { %860 = vmatpush.msra.mxu3 %v545_v55  ;;  %841 = vmatpush.msra.mxu2 %v528_v57  ;;  %v617_v25 = vld [vmem:[#allocation5 + $0x3d0] sm:$0xff]  ;;  %v567_v26 = vld [vmem:[#allocation5 + $0x240] sm:$0xff]  ;;  %v584_v27 = vld [vmem:[#allocation5 + $0x2c8] sm:$0xff] }
  0x2c   :  { %821 = vmatpush.msra.mxu1 %v512_v58  ;;  %802 = vmatpush.msra.mxu0 %v495_v60  ;;  %v599_v28 = vld [vmem:[#allocation5 + $0x340] sm:$0xff]  ;;  %v616_v29 = vld [vmem:[#allocation5 + $0x3c8] sm:$0xff]  ;;  %v566_v33 = vld [vmem:[#allocation5 + $0x238] sm:$0xff] }
  0x2d   :  { %861 = vmatpush.msra.mxu3 %v544_v59  ;;  %842 = vmatpush.msra.mxu2 %v527_v61  ;;  %v50_v30 = vld [vmem:[#allocation2] sm:$0xff]  ;;  %v52_v37 = vld [vmem:[#allocation2 + $0x10] sm:$0xff]  ;;  %v598_v39 = vld [vmem:[#allocation5 + $0x338] sm:$0xff] }
  0x2e   :  { %867 = vmatpush.msrb.mxu0 %v574_v62  ;;  %822 = vmatpush.msra.mxu1 %v511_v0  ;;  %v66_v31 = vld [vmem:[#allocation2 + $0x80] sm:$0xff]  ;;  %v68_v38 = vld [vmem:[#allocation2 + $0x90] sm:$0xff]  ;;  %v582_v46 = vld [vmem:[#allocation5 + $0x2b8] sm:$0xff] }
  0x2f   :  { %907 = vmatpush.msrb.mxu2 %v606_v63  ;;  %862 = vmatpush.msra.mxu3 %v543_v1  ;;  %v82_v32 = vld [vmem:[#allocation2 + $0x100] sm:$0xff]  ;;  %v114_v36 = vadd.f32 %v66_v31, %v50_v30  ;;  %v84_v41 = vld [vmem:[#allocation2 + $0x110] sm:$0xff]  ;;  %v128_v43 = vadd.f32 %v68_v38, %v52_v37  ;;  %v51_v52 = vld [vmem:[#allocation2 + $0x8] sm:$0xff] }
  0x30   :  { %868 = vmatpush.msrb.mxu0 %v573_v2  ;;  %887 = vmatpush.msrb.mxu1 %v590_v3  ;;  %v583_v34 = vld [vmem:[#allocation5 + $0x2c0] sm:$0xff]  ;;  %v100_v42 = vld [vmem:[#allocation2 + $0x190] sm:$0xff]  ;;  %v67_v53 = vld [vmem:[#allocation2 + $0x88] sm:$0xff] }
  0x31   :  { %908 = vmatpush.msrb.mxu2 %v605_v4  ;;  %927 = vmatpush.msrb.mxu3 %v622_v5  ;;  %v98_v35 = vld [vmem:[#allocation2 + $0x180] sm:$0xff]  ;;  %v565_v45 = vld [vmem:[#allocation5 + $0x230] sm:$0xff]  ;;  %v115_v47 = vrot.slane %v114_v36, 4  ;;  %v240_v48 = vadd.f32 %v100_v42, %v84_v41  ;;  %v129_v51 = vrot.slane %v128_v43, 4  ;;  %v83_v54 = vld [vmem:[#allocation2 + $0x108] sm:$0xff]  ;;  %v121_v58 = vadd.f32 %v67_v53, %v51_v52 }
  0x32   :  { %869 = vmatpush.msrb.mxu0 %v572_v6  ;;  %888 = vmatpush.msrb.mxu1 %v589_v7  ;;  %v226_v40 = vadd.f32 %v98_v35, %v82_v32  ;;  %v615_v44 = vld [vmem:[#allocation5 + $0x3c0] sm:$0xff]  ;;  %v597_v49 = vld [vmem:[#allocation5 + $0x330] sm:$0xff]  ;;  %v99_v57 = vld [vmem:[#allocation2 + $0x188] sm:$0xff] }
  0x33   :  { %909 = vmatpush.msrb.mxu2 %v604_v8  ;;  %928 = vmatpush.msrb.mxu3 %v621_v9  ;;  %v116_v55 = vadd.f32 %v115_v47, %v114_v36  ;;  %v241_v56 = vrot.slane %v240_v48, 4  ;;  %v53_v59 = vld [vmem:[#allocation2 + $0x18] sm:$0xff]  ;;  %v130_v63 = vadd.f32 %v129_v51, %v128_v43  ;;  %v233_v0 = vadd.f32 %v99_v57, %v83_v54  ;;  %v564_v3 = vld [vmem:[#allocation5 + $0x228] sm:$0xff]  ;;  %v581_v4 = vld [vmem:[#allocation5 + $0x2b0] sm:$0xff] }
  0x34   :  { %870 = vmatpush.msrb.mxu0 %v571_v10  ;;  %889 = vmatpush.msrb.mxu1 %v588_v11  ;;  %v227_v50 = vrot.slane %v226_v40, 4  ;;  %v69_v60 = vld [vmem:[#allocation2 + $0x98] sm:$0xff]  ;;  %v122_v7 = vrot.slane %v121_v58, 4  ;;  %v596_v9 = vld [vmem:[#allocation5 + $0x328] sm:$0xff]  ;;  %v613_v10 = vld [vmem:[#allocation5 + $0x3b0] sm:$0xff] }
  0x35   :  { %910 = vmatpush.msrb.mxu2 %v603_v12  ;;  %929 = vmatpush.msrb.mxu3 %v620_v13  ;;  %v614_v61 = vld [vmem:[#allocation5 + $0x3b8] sm:$0xff]  ;;  %v117_v5 = vrot.slane %v116_v55, 2  ;;  %v242_v6 = vadd.f32 %v241_v56, %v240_v48  ;;  %v135_v8 = vadd.f32 %v69_v60, %v53_v59  ;;  %v131_v12 = vrot.slane %v130_v63, 2  ;;  %v561_v35 = vld [vmem:[#allocation5 + $0x210] sm:$0xff]  ;;  %v560_v43 = vld [vmem:[#allocation5 + $0x208] sm:$0xff] }
  0x36   :  { %871 = vmatpush.msrb.mxu0 %v570_v14  ;;  %890 = vmatpush.msrb.mxu1 %v587_v15  ;;  %v228_v62 = vadd.f32 %v227_v50, %v226_v40  ;;  %v85_v1 = vld [vmem:[#allocation2 + $0x118] sm:$0xff]  ;;  %v234_v13 = vrot.slane %v233_v0, 4  ;;  %v563_v15 = vld [vmem:[#allocation5 + $0x220] sm:$0xff]  ;;  %v593_v41 = vld [vmem:[#allocation5 + $0x310] sm:$0xff] }
  0x37   :  { %911 = vmatpush.msrb.mxu2 %v602_v16  ;;  %930 = vmatpush.msrb.mxu3 %v619_v17  ;;  %v101_v2 = vld [vmem:[#allocation2 + $0x198] sm:$0xff]  ;;  %v580_v16 = vld [vmem:[#allocation5 + $0x2a8] sm:$0xff]  ;;  %v118_v17 = vadd.f32 %v117_v5, %v116_v55  ;;  %v577_v48 = vld [vmem:[#allocation5 + $0x290] sm:$0xff] }
  0x38   :  { %872 = vmatpush.msrb.mxu0 %v569_v18  ;;  %891 = vmatpush.msrb.mxu1 %v586_v19  ;;  %v229_v11 = vrot.slane %v228_v62, 2  ;;  %v247_v14 = vadd.f32 %v101_v2, %v85_v1  ;;  %v243_v18 = vrot.slane %v242_v6, 2  ;;  %v123_v19 = vadd.f32 %v122_v7, %v121_v58  ;;  %v578_v36 = vld [vmem:[#allocation5 + $0x298] sm:$0xff]  ;;  %v56_v53 = vld [vmem:[#allocation2 + $0x30] sm:$0xff]  ;;  %v592_v55 = vld [vmem:[#allocation5 + $0x308] sm:$0xff] }
  0x39   :  { %912 = vmatpush.msrb.mxu2 %v601_v20  ;;  %931 = vmatpush.msrb.mxu3 %v618_v21  ;;  %v136_v20 = vrot.slane %v135_v8, 4  ;;  %v595_v21 = vld [vmem:[#allocation5 + $0x320] sm:$0xff]  ;;  %v119_v30 = vrot.slane %v118_v17, 1  ;;  %v610_v42 = vld [vmem:[#allocation5 + $0x398] sm:$0xff]  ;;  %v72_v54 = vld [vmem:[#allocation2 + $0xb0] sm:$0xff] }
  0x3a   :  { %873 = vmatpush.msrb.mxu0 %v568_v22  ;;  %892 = vmatpush.msrb.mxu1 %v585_v23  ;;  %v612_v22 = vld [vmem:[#allocation5 + $0x3a8] sm:$0xff]  ;;  %v230_v23 = vadd.f32 %v229_v11, %v228_v62  ;;  %v244_v31 = vadd.f32 %v243_v18, %v242_v6  ;;  %v124_v32 = vrot.slane %v123_v19, 2  ;;  %v609_v56 = vld [vmem:[#allocation5 + $0x390] sm:$0xff]  ;;  %v559_v57 = vld [vmem:[#allocation5 + $0x200] sm:$0xff] }
  0x3b   :  { %913 = vmatpush.msrb.mxu2 %v600_v24  ;;  %932 = vmatpush.msrb.mxu3 %v617_v25  ;;  %v132_v24 = vadd.f32 %v131_v12, %v130_v63  ;;  %v235_v25 = vadd.f32 %v234_v13, %v233_v0  ;;  %v576_v62 = vld [vmem:[#allocation5 + $0x288] sm:$0xff]  ;;  %v591_v63 = vld [vmem:[#allocation5 + $0x300] sm:$0xff] }
  0x3c   :  { %874 = vmatpush.msrb.mxu0 %v567_v26  ;;  %893 = vmatpush.msrb.mxu1 %v584_v27  ;;  %v248_v26 = vrot.slane %v247_v14, 4  ;;  %v562_v27 = vld [vmem:[#allocation5 + $0x218] sm:$0xff]  ;;  %v231_v37 = vrot.slane %v230_v23, 1  ;;  %v608_v0 = vld [vmem:[#allocation5 + $0x388] sm:$0xff]  ;;  %v54_v11 = vld [vmem:[#allocation2 + $0x20] sm:$0xff] }
  0x3d   :  { %914 = vmatpush.msrb.mxu2 %v599_v28  ;;  %933 = vmatpush.msrb.mxu3 %v616_v29  ;;  %v579_v28 = vld [vmem:[#allocation5 + $0x2a0] sm:$0xff]  ;;  %v594_v29 = vld [vmem:[#allocation5 + $0x318] sm:$0xff]  ;;  %v133_v38 = vrot.slane %v132_v24, 1 }
  0x3e   :  { %875 = vmatpush.msrb.mxu0 %v566_v33  ;;  %894 = vmatpush.msrb.mxu1 %v583_v34  ;;  %v137_v33 = vadd.f32 %v136_v20, %v135_v8  ;;  %v611_v34 = vld [vmem:[#allocation5 + $0x3a0] sm:$0xff]  ;;  %v249_v40 = vadd.f32 %v248_v26, %v247_v14  ;;  %v88_v8 = vld [vmem:[#allocation2 + $0x130] sm:$0xff] }
  0x3f   :  { %915 = vmatpush.msrb.mxu2 %v598_v39  ;;  %934 = vmatpush.msrb.mxu3 %v615_v44  ;;  %v236_v39 = vrot.slane %v235_v25, 2  ;;  %v120_v44 = vadd.f32 %v119_v30, %v118_v17  ;;  %v134_v50 = vadd.f32 %v133_v38, %v132_v24  ;;  %v86_v17 = vld [vmem:[#allocation2 + $0x120] sm:$0xff]  ;;  %v670_v24 = vld [vmem:[#allocation5 + $0x578] sm:$0xff]  ;;  %v637_v38 = vld [vmem:[#allocation5 + $0x470] sm:$0xff] }
  0x40   :  { %876 = vmatpush.msrb.mxu0 %v565_v45  ;;  %895 = vmatpush.msrb.mxu1 %v582_v46  ;;  %v245_v45 = vrot.slane %v244_v31, 1  ;;  %v125_v46 = vadd.f32 %v124_v32, %v123_v19  ;;  %v138_v47 = vrot.slane %v137_v33, 2  ;;  %v250_v52 = vrot.slane %v249_v40, 2  ;;  %v102_v18 = vld [vmem:[#allocation2 + $0x1a0] sm:$0xff] }
  0x41   :  { %916 = vmatpush.msrb.mxu2 %v597_v49  ;;  %935 = vmatpush.msrb.mxu3 %v614_v61  ;;  %v232_v49 = vadd.f32 %v231_v37, %v230_v23  ;;  %v237_v51 = vadd.f32 %v236_v39, %v235_v25  ;;  %v1292_v58 = vmul.f32 0.0625, %v120_v44  ;;  %v1296_v2 = vmul.f32 0.0625, %v134_v50  ;;  %v638_v23 = vld [vmem:[#allocation5 + $0x478] sm:$0xff]  ;;  %v607_v30 = vld [vmem:[#allocation5 + $0x380] sm:$0xff] }
  0x42   :  { %877 = vmatpush.msrb.mxu0 %v564_v3  ;;  %896 = vmatpush.msrb.mxu1 %v581_v4  ;;  %v246_v59 = vadd.f32 %v245_v45, %v244_v31  ;;  %v126_v60 = vrot.slane %v125_v46, 1  ;;  %v139_v61 = vadd.f32 %v138_v47, %v137_v33  ;;  %v251_v4 = vadd.f32 %v250_v52, %v249_v40  ;;  %v654_v39 = vld [vmem:[#allocation5 + $0x4f8] sm:$0xff]  ;;  %v636_v45 = vld [vmem:[#allocation5 + $0x468] sm:$0xff] }
  0x43   :  { %917 = vmatpush.msrb.mxu2 %v596_v9  ;;  %936 = vmatpush.msrb.mxu3 %v613_v10  ;;  %v1294_v1 = vmul.f32 0.0625, %v232_v49  ;;  %v238_v3 = vrot.slane %v237_v51, 1  ;;  %v104_v9 = vld [vmem:[#allocation2 + $0x1b0] sm:$0xff]  ;;  %v156_v10 = vadd.f32 %v72_v54, %v56_v53  ;;  %v403_v13 = vrot.slane %v1296_v2, 4  ;;  %v686_v44 = vld [vmem:[#allocation5 + $0x5f8] sm:$0xff]  ;;  %v668_v52 = vld [vmem:[#allocation5 + $0x568] sm:$0xff] }
  0x44   :  { %878 = vmatpush.msrb.mxu0 %v563_v15  ;;  %897 = vmatpush.msrb.mxu1 %v580_v16  ;;  %v1298_v5 = vmul.f32 0.0625, %v246_v59  ;;  %v127_v6 = vadd.f32 %v126_v60, %v125_v46  ;;  %v140_v7 = vrot.slane %v139_v61, 1  ;;  %v252_v15 = vrot.slane %v251_v4, 1  ;;  %v70_v16 = vld [vmem:[#allocation2 + $0xa0] sm:$0xff]  ;;  %v57_v54 = vld [vmem:[#allocation2 + $0x38] sm:$0xff] }
  0x45   :  { %918 = vmatpush.msrb.mxu2 %v595_v21  ;;  %937 = vmatpush.msrb.mxu3 %v612_v22  ;;  %v755_v12 = vsel %vm458_vm0, %v1294_v1, %v1292_v58  ;;  %v239_v14 = vadd.f32 %v238_v3, %v237_v51  ;;  %v142_v33 = vadd.f32 %v70_v16, %v54_v11  ;;  %v653_v51 = vld [vmem:[#allocation5 + $0x4f0] sm:$0xff]  ;;  %v73_v59 = vld [vmem:[#allocation2 + $0xb8] sm:$0xff]  ;;  %v71_v3 = vld [vmem:[#allocation2 + $0xa8] sm:$0xff] }
  0x46   :  { %879 = vmatpush.msrb.mxu0 %v562_v27  ;;  %898 = vmatpush.msrb.mxu1 %v579_v28  ;;  %v415_v19 = vrot.slane %v1298_v5, 4  ;;  %v757_v20 = vsel %vm458_vm0, %v1298_v5, %v1296_v2  ;;  %v339_v21 = vmul.f32 0.0625, %v127_v6  ;;  %v141_v22 = vadd.f32 %v140_v7, %v139_v61  ;;  %v89_v60 = vld [vmem:[#allocation2 + $0x138] sm:$0xff]  ;;  %v55_v2 = vld [vmem:[#allocation2 + $0x28] sm:$0xff]  ;;  %v635_v5 = vld [vmem:[#allocation5 + $0x460] sm:$0xff] }
  0x47   :  { %919 = vmatpush.msrb.mxu2 %v594_v29  ;;  %938 = vmatpush.msrb.mxu3 %v611_v34  ;;  %v355_v25 = vmul.f32 0.0625, %v239_v14  ;;  %v253_v26 = vadd.f32 %v252_v15, %v251_v4  ;;  %v157_v27 = vrot.slane %v156_v10, 4  ;;  %v268_v28 = vadd.f32 %v104_v9, %v88_v8  ;;  %v575_v29 = vld [vmem:[#allocation5 + $0x280] sm:$0xff]  ;;  %v105_v61 = vld [vmem:[#allocation2 + $0x1b8] sm:$0xff]  ;;  %v652_v6 = vld [vmem:[#allocation5 + $0x4e8] sm:$0xff] }
  0x48   :  { %880 = vmatpush.msrb.mxu0 %v561_v35  ;;  %899 = vmatpush.msrb.mxu1 %v578_v36  ;;  %v402_v31 = vrot.slane %v339_v21, 6  ;;  %v341_v32 = vmul.f32 0.0625, %v141_v22  ;;  %v254_v34 = vadd.f32 %v102_v18, %v86_v17  ;;  %v143_v47 = vrot.slane %v142_v33, 4  ;;  %v667_v11 = vld [vmem:[#allocation5 + $0x560] sm:$0xff]  ;;  %v634_v14 = vld [vmem:[#allocation5 + $0x458] sm:$0xff]  ;;  %v103_v22 = vld [vmem:[#allocation2 + $0x1a8] sm:$0xff] }
  0x49   :  { %920 = vmatpush.msrb.mxu2 %v593_v41  ;;  %939 = vmatpush.msrb.mxu3 %v610_v42  ;;  %v414_v35 = vrot.slane %v355_v25, 6  ;;  %v756_v36 = vsel %vm458_vm0, %v355_v25, %v339_v21  ;;  %v357_v37 = vmul.f32 0.0625, %v253_v26  ;;  %v158_v40 = vadd.f32 %v157_v27, %v156_v10  ;;  %v651_v18 = vld [vmem:[#allocation5 + $0x4e0] sm:$0xff]  ;;  %v87_v21 = vld [vmem:[#allocation2 + $0x128] sm:$0xff]  ;;  %v666_v26 = vld [vmem:[#allocation5 + $0x558] sm:$0xff] }
  0x4a   :  { %881 = vmatpush.msrb.mxu0 %v560_v43  ;;  %900 = vmatpush.msrb.mxu1 %v577_v48  ;;  %v427_v41 = vsel %vm426_vm1, %v1292_v58, %v402_v31  ;;  %v404_v42 = vrot.slane %v341_v32, 2  ;;  %v669_v43 = vld [vmem:[#allocation5 + $0x570] sm:$0xff]  ;;  %v269_v46 = vrot.slane %v268_v28, 4  ;;  %v255_v58 = vrot.slane %v254_v34, 4  ;;  %v683_v27 = vld [vmem:[#allocation5 + $0x5e0] sm:$0xff] }
  0x4b   :  { %921 = vmatpush.msrb.mxu2 %v592_v55  ;;  %940 = vmatpush.msrb.mxu3 %v609_v56  ;;  %v441_v48 = vsel %vm426_vm1, %v1294_v1, %v414_v35  ;;  %v416_v49 = vrot.slane %v357_v37, 2  ;;  %v758_v50 = vsel %vm458_vm0, %v357_v37, %v341_v32  ;;  %v159_v53 = vrot.slane %v158_v40, 2 }
  0x4c   :  { %882 = vmatpush.msrb.mxu0 %v559_v57  ;;  %901 = vmatpush.msrb.mxu1 %v576_v62  ;;  %v429_v55 = vsel %vm428_vm2, %v403_v13, %v404_v42  ;;  %v270_v56 = vadd.f32 %v269_v46, %v268_v28  ;;  %v144_v57 = vadd.f32 %v143_v47, %v142_v33  ;;  %v633_v33 = vld [vmem:[#allocation5 + $0x450] sm:$0xff]  ;;  %v632_v42 = vld [vmem:[#allocation5 + $0x448] sm:$0xff] }
  0x4d   :  { %922 = vmatpush.msrb.mxu2 %v591_v63  ;;  %941 = vmatpush.msrb.mxu3 %v608_v0  ;;  %v431_v62 = vsel %vm430_vm3, %v427_v41, %v429_v55  ;;  %v442_v63 = vsel %vm428_vm2, %v415_v19, %v416_v49  ;;  %v685_v0 = vld [vmem:[#allocation5 + $0x5f0] sm:$0xff]  ;;  %v160_v1 = vadd.f32 %v159_v53, %v158_v40  ;;  %v682_v40 = vld [vmem:[#allocation5 + $0x5d8] sm:$0xff]  ;;  %v631_v53 = vld [vmem:[#allocation5 + $0x440] sm:$0xff] }
  0x4e   :  { %803 = vmatmul.f32.vlgmr.msra.gmra.mxu0 %v755_v12  ;;  %843 = vmatmul.f32.vlgmr.msra.gmra.mxu2 %v757_v20  ;;  %v443_v4 = vsel %vm430_vm3, %v441_v48, %v442_v63  ;;  %v271_v7 = vrot.slane %v270_v56, 2  ;;  %v145_v8 = vrot.slane %v144_v57, 2  ;;  %v256_v9 = vadd.f32 %v255_v58, %v254_v34  ;;  %v684_v12 = vld [vmem:[#allocation5 + $0x5e8] sm:$0xff]  ;;  %v650_v34 = vld [vmem:[#allocation5 + $0x4d8] sm:$0xff]  ;;  %v649_v47 = vld [vmem:[#allocation5 + $0x4d0] sm:$0xff] }
  0x4f   :  { %947 = vmatpush.msra.mxu0 %v638_v23  ;;  %987 = vmatpush.msra.mxu2 %v670_v24  ;;  %v1318_v10 = vrot.slane %v443_v4, 7  ;;  %v161_v13 = vrot.slane %v160_v1, 1  ;;  %v163_v15 = vadd.f32 %v73_v59, %v57_v54  ;;  %v275_v16 = vadd.f32 %v105_v61, %v89_v60  ;;  %v664_v48 = vld [vmem:[#allocation5 + $0x548] sm:$0xff]  ;;  %v681_v49 = vld [vmem:[#allocation5 + $0x5d0] sm:$0xff]  ;;  %v663_v55 = vld [vmem:[#allocation5 + $0x540] sm:$0xff] }
  0x50   :  { %902 = vmatpush.msrb.mxu1 %v575_v29  ;;  %942 = vmatpush.msrb.mxu3 %v607_v30  ;;  %v272_v17 = vadd.f32 %v271_v7, %v270_v56  ;;  %v146_v19 = vadd.f32 %v145_v8, %v144_v57  ;;  %v257_v20 = vrot.slane %v256_v9, 2  ;;  %v149_v23 = vadd.f32 %v71_v3, %v55_v2  ;;  %v648_v54 = vld [vmem:[#allocation5 + $0x4c8] sm:$0xff]  ;;  %v58_v60 = vld [vmem:[#allocation2 + $0x40] sm:$0xff]  ;;  %v60_v4 = vld [vmem:[#allocation2 + $0x50] sm:$0xff] }
  0x51   :  { %823 = vmatmul.f32.vlgmr.msra.gmra.mxu1 %v756_v36  ;;  %863 = vmatmul.f32.vlgmr.msra.gmra.mxu3 %v758_v50  ;;  %v1322_v24 = vsel %vm458_vm0, %v1318_v10, %v431_v62  ;;  %v162_v25 = vadd.f32 %v161_v13, %v160_v1  ;;  %v164_v28 = vrot.slane %v163_v15, 4  ;;  %v276_v29 = vrot.slane %v275_v16, 4  ;;  %v74_v61 = vld [vmem:[#allocation2 + $0xc0] sm:$0xff] }
  0x52   :  { %948 = vmatpush.msra.mxu0 %v637_v38  ;;  %967 = vmatpush.msra.mxu1 %v654_v39  ;;  %v273_v30 = vrot.slane %v272_v17, 1  ;;  %v147_v31 = vrot.slane %v146_v19, 1  ;;  %v258_v32 = vadd.f32 %v257_v20, %v256_v9  ;;  %v150_v35 = vrot.slane %v149_v23, 4  ;;  %v665_v39 = vld [vmem:[#allocation5 + $0x550] sm:$0xff]  ;;  %v90_v62 = vld [vmem:[#allocation2 + $0x140] sm:$0xff] }
  0x53   :  { %988 = vmatpush.msra.mxu2 %v669_v43  ;;  %1007 = vmatpush.msra.mxu3 %v686_v44  ;;  %v1324_v36 = vmul.f32 0.0625, %v162_v25  ;;  %v165_v37 = vadd.f32 %v164_v28, %v163_v15  ;;  %v277_v38 = vadd.f32 %v276_v29, %v275_v16  ;;  %v261_v41 = vadd.f32 %v103_v22, %v87_v21  ;;  %v106_v3 = vld [vmem:[#allocation2 + $0x1c0] sm:$0xff]  ;;  %v662_v22 = vld [vmem:[#allocation5 + $0x538] sm:$0xff] }
  0x54   :  { %949 = vmatpush.msra.mxu0 %v636_v45  ;;  %968 = vmatpush.msra.mxu1 %v653_v51  ;;  %v274_v43 = vadd.f32 %v273_v30, %v272_v17  ;;  %v148_v44 = vadd.f32 %v147_v31, %v146_v19  ;;  %v259_v45 = vrot.slane %v258_v32, 1  ;;  %v151_v46 = vadd.f32 %v150_v35, %v149_v23  ;;  %v647_v16 = vld [vmem:[#allocation5 + $0x4c0] sm:$0xff]  ;;  %v108_v19 = vld [vmem:[#allocation2 + $0x1d0] sm:$0xff]  ;;  %v646_v31 = vld [vmem:[#allocation5 + $0x4b8] sm:$0xff] }
  0x55   :  { %989 = vmatpush.msra.mxu2 %v668_v52  ;;  %1008 = vmatpush.msra.mxu3 %v685_v0  ;;  %v166_v50 = vrot.slane %v165_v37, 2  ;;  %v278_v51 = vrot.slane %v277_v38, 2  ;;  %v262_v52 = vrot.slane %v261_v41, 4  ;;  %v406_v63 = vrot.slane %v1324_v36, 4  ;;  %v679_v23 = vld [vmem:[#allocation5 + $0x5c0] sm:$0xff]  ;;  %v629_v30 = vld [vmem:[#allocation5 + $0x430] sm:$0xff] }
  0x56   :  { %950 = vmatpush.msra.mxu0 %v635_v5  ;;  %969 = vmatpush.msra.mxu1 %v652_v6  ;;  %v1326_v56 = vmul.f32 0.0625, %v274_v43  ;;  %v260_v57 = vadd.f32 %v259_v45, %v258_v32  ;;  %v1328_v58 = vmul.f32 0.0625, %v148_v44  ;;  %v152_v59 = vrot.slane %v151_v46, 2  ;;  %v76_v5 = vld [vmem:[#allocation2 + $0xd0] sm:$0xff]  ;;  %v678_v35 = vld [vmem:[#allocation5 + $0x5b8] sm:$0xff]  ;;  %v628_v43 = vld [vmem:[#allocation5 + $0x428] sm:$0xff] }
  0x57   :  { %990 = vmatpush.msra.mxu2 %v667_v11  ;;  %1009 = vmatpush.msra.mxu3 %v684_v12  ;;  %v167_v0 = vadd.f32 %v166_v50, %v165_v37  ;;  %v279_v1 = vadd.f32 %v278_v51, %v277_v38  ;;  %v263_v2 = vadd.f32 %v262_v52, %v261_v41  ;;  %v680_v11 = vld [vmem:[#allocation5 + $0x5c8] sm:$0xff]  ;;  %v630_v12 = vld [vmem:[#allocation5 + $0x438] sm:$0xff]  ;;  %v645_v44 = vld [vmem:[#allocation5 + $0x4b0] sm:$0xff] }
  0x58   :  { %951 = vmatpush.msra.mxu0 %v634_v14  ;;  %970 = vmatpush.msra.mxu1 %v651_v18  ;;  %v418_v6 = vrot.slane %v1326_v56, 4  ;;  %v761_v7 = vsel %vm458_vm0, %v1326_v56, %v1324_v36  ;;  %v1335_v8 = vmul.f32 0.0625, %v260_v57  ;;  %v153_v9 = vadd.f32 %v152_v59, %v151_v46  ;;  %v92_v18 = vld [vmem:[#allocation2 + $0x150] sm:$0xff]  ;;  %v644_v59 = vld [vmem:[#allocation5 + $0x4a8] sm:$0xff] }
  0x59   :  { %991 = vmatpush.msra.mxu2 %v666_v26  ;;  %1010 = vmatpush.msra.mxu3 %v683_v27  ;;  %v168_v13 = vrot.slane %v167_v0, 1  ;;  %v280_v14 = vrot.slane %v279_v1, 1  ;;  %v264_v15 = vrot.slane %v263_v2, 2  ;;  %v170_v17 = vadd.f32 %v74_v61, %v58_v60  ;;  %v659_v60 = vld [vmem:[#allocation5 + $0x520] sm:$0xff]  ;;  %v676_v61 = vld [vmem:[#allocation5 + $0x5a8] sm:$0xff] }
  0x5a   :  { %952 = vmatpush.msra.mxu0 %v633_v33  ;;  %971 = vmatpush.msra.mxu1 %v650_v34  ;;  %v759_v20 = vsel %vm458_vm0, %v1335_v8, %v1328_v58  ;;  %v154_v21 = vrot.slane %v153_v9, 1  ;;  %v282_v25 = vadd.f32 %v106_v3, %v90_v62  ;;  %v184_v26 = vadd.f32 %v76_v5, %v60_v4  ;;  %v661_v34 = vld [vmem:[#allocation5 + $0x530] sm:$0xff] }
  0x5b   :  { %992 = vmatpush.msra.mxu2 %v665_v39  ;;  %1011 = vmatpush.msra.mxu3 %v682_v40  ;;  %v169_v27 = vadd.f32 %v168_v13, %v167_v0  ;;  %v281_v28 = vadd.f32 %v280_v14, %v279_v1  ;;  %v265_v29 = vadd.f32 %v264_v15, %v263_v2  ;;  %v171_v32 = vrot.slane %v170_v17, 4  ;;  %v626_v0 = vld [vmem:[#allocation5 + $0x418] sm:$0xff]  ;;  %v643_v1 = vld [vmem:[#allocation5 + $0x4a0] sm:$0xff]  ;;  %v75_v13 = vld [vmem:[#allocation2 + $0xc8] sm:$0xff] }
  0x5c   :  { %953 = vmatpush.msra.mxu0 %v632_v42  ;;  %972 = vmatpush.msra.mxu1 %v649_v47  ;;  %v155_v33 = vadd.f32 %v154_v21, %v153_v9  ;;  %v283_v37 = vrot.slane %v282_v25, 4  ;;  %v185_v38 = vrot.slane %v184_v26, 4  ;;  %v296_v39 = vadd.f32 %v108_v19, %v92_v18  ;;  %v660_v47 = vld [vmem:[#allocation5 + $0x528] sm:$0xff]  ;;  %v77_v18 = vld [vmem:[#allocation2 + $0xd8] sm:$0xff]  ;;  %v675_v21 = vld [vmem:[#allocation5 + $0x5a0] sm:$0xff] }
  0x5d   :  { %993 = vmatpush.msra.mxu2 %v664_v48  ;;  %1012 = vmatpush.msra.mxu3 %v681_v49  ;;  %v345_v40 = vmul.f32 0.0625, %v169_v27  ;;  %v361_v41 = vmul.f32 0.0625, %v281_v28  ;;  %v266_v42 = vrot.slane %v265_v29, 1  ;;  %v172_v45 = vadd.f32 %v171_v32, %v170_v17  ;;  %v677_v48 = vld [vmem:[#allocation5 + $0x5b0] sm:$0xff]  ;;  %v627_v49 = vld [vmem:[#allocation5 + $0x420] sm:$0xff]  ;;  %v91_v14 = vld [vmem:[#allocation2 + $0x148] sm:$0xff] }
  0x5e   :  { %923 = vmatmul.f32.vlgmr.msrb.gmra.mxu2 %v761_v7  ;;  %954 = vmatpush.msra.mxu0 %v631_v53  ;;  %v343_v46 = vmul.f32 0.0625, %v155_v33  ;;  %v284_v50 = vadd.f32 %v283_v37, %v282_v25  ;;  %v186_v51 = vadd.f32 %v185_v38, %v184_v26  ;;  %v297_v52 = vrot.slane %v296_v39, 4  ;;  %v107_v17 = vld [vmem:[#allocation2 + $0x1c8] sm:$0xff]  ;;  %v641_v38 = vld [vmem:[#allocation5 + $0x490] sm:$0xff] }
  0x5f   :  { %973 = vmatpush.msra.mxu1 %v648_v54  ;;  %994 = vmatpush.msra.mxu2 %v663_v55  ;;  %v407_v53 = vrot.slane %v345_v40, 2  ;;  %v419_v54 = vrot.slane %v361_v41, 2  ;;  %v762_v55 = vsel %vm458_vm0, %v361_v41, %v345_v40  ;;  %v267_v57 = vadd.f32 %v266_v42, %v265_v29  ;;  %v624_v37 = vld [vmem:[#allocation5 + $0x408] sm:$0xff] }
  0x60   :  { %883 = vmatmul.f32.vlgmr.msrb.gmra.mxu0 %v759_v20  ;;  %1013 = vmatpush.msra.mxu3 %v680_v11  ;;  %v405_v62 = vrot.slane %v343_v46, 6  ;;  %v173_v2 = vrot.slane %v172_v45, 2  ;;  %v285_v3 = vrot.slane %v284_v50, 2  ;;  %v187_v4 = vrot.slane %v186_v51, 2  ;;  %v658_v20 = vld [vmem:[#allocation5 + $0x518] sm:$0xff] }
  0x61   :  { %955 = vmatpush.msra.mxu0 %v630_v12  ;;  %974 = vmatpush.msra.mxu1 %v647_v16  ;;  %v433_v5 = vsel %vm428_vm2, %v406_v63, %v407_v53  ;;  %v445_v7 = vsel %vm428_vm2, %v418_v6, %v419_v54  ;;  %v359_v9 = vmul.f32 0.0625, %v267_v57  ;;  %v298_v11 = vadd.f32 %v297_v52, %v296_v39  ;;  %v59_v12 = vld [vmem:[#allocation2 + $0x48] sm:$0xff]  ;;  %v61_v63 = vld [vmem:[#allocation2 + $0x58] sm:$0xff]  ;;  %v655_v57 = vld [vmem:[#allocation5 + $0x500] sm:$0xff] }
  0x62   :  { %995 = vmatpush.msra.mxu2 %v662_v22  ;;  %1014 = vmatpush.msra.mxu3 %v679_v23  ;;  %v432_v15 = vsel %vm426_vm1, %v1328_v58, %v405_v62  ;;  %v174_v16 = vadd.f32 %v173_v2, %v172_v45  ;;  %v286_v36 = vadd.f32 %v285_v3, %v284_v50  ;;  %v625_v58 = vld [vmem:[#allocation5 + $0x410] sm:$0xff]  ;;  %v642_v23 = vld [vmem:[#allocation5 + $0x498] sm:$0xff]  ;;  %v656_v39 = vld [vmem:[#allocation5 + $0x508] sm:$0xff] }
  0x63   :  { %956 = vmatpush.msra.mxu0 %v629_v30  ;;  %975 = vmatpush.msra.mxu1 %v646_v31  ;;  %v417_v56 = vrot.slane %v359_v9, 6  ;;  %v434_v6 = vsel %vm430_vm3, %v432_v15, %v433_v5  ;;  %v760_v19 = vsel %vm458_vm0, %v359_v9, %v343_v46  ;;  %v188_v22 = vadd.f32 %v187_v4, %v186_v51  ;;  %v657_v30 = vld [vmem:[#allocation5 + $0x510] sm:$0xff]  ;;  %v674_v31 = vld [vmem:[#allocation5 + $0x598] sm:$0xff]  ;;  %v640_v50 = vld [vmem:[#allocation5 + $0x488] sm:$0xff] }
  0x64   :  { %996 = vmatpush.msra.mxu2 %v661_v34  ;;  %1015 = vmatpush.msra.mxu3 %v678_v35  ;;  %v175_v25 = vrot.slane %v174_v16, 1  ;;  %v287_v26 = vrot.slane %v286_v36, 1  ;;  %v299_v27 = vrot.slane %v298_v11, 2  ;;  %v177_v28 = vadd.f32 %v75_v13, %v59_v12  ;;  %v639_v9 = vld [vmem:[#allocation5 + $0x480] sm:$0xff] }
  0x65   :  { %943 = vmatmul.f32.vlgmr.msrb.gmra.mxu3 %v762_v55  ;;  %957 = vmatpush.msra.mxu0 %v628_v43  ;;  %v444_v29 = vsel %vm426_vm1, %v1335_v8, %v417_v56  ;;  %v189_v32 = vrot.slane %v188_v22, 1  ;;  %v289_v33 = vadd.f32 %v107_v17, %v91_v14  ;;  %v191_v34 = vadd.f32 %v77_v18, %v61_v63  ;;  %v673_v8 = vld [vmem:[#allocation5 + $0x590] sm:$0xff]  ;;  %v671_v12 = vld [vmem:[#allocation5 + $0x580] sm:$0xff]  ;;  %v750_v56 = vld [vmem:[#allocation5 + $0x7f8] sm:$0xff] }
  0x66   :  { %976 = vmatpush.msra.mxu1 %v645_v44  ;;  %997 = vmatpush.msra.mxu2 %v660_v47  ;;  %v446_v35 = vsel %vm430_vm3, %v444_v29, %v445_v7  ;;  %v176_v40 = vadd.f32 %v175_v25, %v174_v16  ;;  %v288_v41 = vadd.f32 %v287_v26, %v286_v36  ;;  %v178_v42 = vrot.slane %v177_v28, 4  ;;  %v93_v47 = vld [vmem:[#allocation2 + $0x158] sm:$0xff]  ;;  %v701_v63 = vld [vmem:[#allocation5 + $0x670] sm:$0xff] }
  0x67   :  { %1016 = vmatpush.msra.mxu3 %v677_v48  ;;  %958 = vmatpush.msra.mxu0 %v627_v49  ;;  %v1354_v43 = vrot.slane %v446_v35, 7  ;;  %v190_v44 = vadd.f32 %v189_v32, %v188_v22  ;;  %v300_v45 = vadd.f32 %v299_v27, %v298_v11  ;;  %v290_v46 = vrot.slane %v289_v33, 4  ;;  %v109_v48 = vld [vmem:[#allocation2 + $0x1d8] sm:$0xff]  ;;  %v623_v49 = vld [vmem:[#allocation5 + $0x400] sm:$0xff]  ;;  %v733_v18 = vld [vmem:[#allocation5 + $0x770] sm:$0xff] }
  0x68   :  { %977 = vmatpush.msra.mxu1 %v644_v59  ;;  %998 = vmatpush.msra.mxu2 %v659_v60  ;;  %v1356_v51 = vmul.f32 0.0625, %v176_v40  ;;  %v1358_v52 = vmul.f32 0.0625, %v288_v41  ;;  %v179_v53 = vadd.f32 %v178_v42, %v177_v28  ;;  %v192_v54 = vrot.slane %v191_v34, 4  ;;  %v672_v59 = vld [vmem:[#allocation5 + $0x588] sm:$0xff]  ;;  %v702_v7 = vld [vmem:[#allocation5 + $0x678] sm:$0xff]  ;;  %v717_v22 = vld [vmem:[#allocation5 + $0x6f0] sm:$0xff] }
  0x69   :  { %903 = vmatmul.f32.vlgmr.msrb.gmra.mxu1 %v760_v19  ;;  %1017 = vmatpush.msra.mxu3 %v676_v61  ;;  %v1362_v55 = vsel %vm458_vm0, %v1354_v43, %v434_v6  ;;  %v301_v60 = vrot.slane %v300_v45, 1  ;;  %v291_v61 = vadd.f32 %v290_v46, %v289_v33  ;;  %v303_v3 = vadd.f32 %v109_v48, %v93_v47  ;;  %v718_v16 = vld [vmem:[#allocation5 + $0x6f8] sm:$0xff]  ;;  %v749_v26 = vld [vmem:[#allocation5 + $0x7f0] sm:$0xff]  ;;  %v699_v27 = vld [vmem:[#allocation5 + $0x660] sm:$0xff] }
  0x6a   :  { %959 = vmatpush.msra.mxu0 %v626_v0  ;;  %978 = vmatpush.msra.mxu1 %v643_v1  ;;  %v763_v62 = vsel %vm458_vm0, %v1358_v52, %v1356_v51  ;;  %v734_v0 = vld [vmem:[#allocation5 + $0x778] sm:$0xff]  ;;  %v180_v1 = vrot.slane %v179_v53, 2  ;;  %v193_v2 = vadd.f32 %v192_v54, %v191_v34  ;;  %v1367_v5 = vmul.f32 0.0625, %v190_v44  ;;  %v716_v28 = vld [vmem:[#allocation5 + $0x6e8] sm:$0xff]  ;;  %v731_v32 = vld [vmem:[#allocation5 + $0x760] sm:$0xff] }
  0x6b   :  { %999 = vmatpush.msra.mxu2 %v658_v20  ;;  %1018 = vmatpush.msra.mxu3 %v675_v21  ;;  %v302_v4 = vadd.f32 %v301_v60, %v300_v45  ;;  %v292_v11 = vrot.slane %v291_v61, 2  ;;  %v304_v15 = vrot.slane %v303_v3, 4  ;;  %v700_v21 = vld [vmem:[#allocation5 + $0x668] sm:$0xff]  ;;  %v62_v34 = vld [vmem:[#allocation2 + $0x60] sm:$0xff]  ;;  %v80_v48 = vld [vmem:[#allocation2 + $0xf0] sm:$0xff] }
  0x6c   :  { %960 = vmatpush.msra.mxu0 %v625_v58  ;;  %979 = vmatpush.msra.mxu1 %v642_v23  ;;  %v181_v13 = vadd.f32 %v180_v1, %v179_v53  ;;  %v194_v14 = vrot.slane %v193_v2, 2  ;;  %v732_v58 = vld [vmem:[#allocation5 + $0x768] sm:$0xff]  ;;  %v78_v35 = vld [vmem:[#allocation2 + $0xe0] sm:$0xff]  ;;  %v698_v54 = vld [vmem:[#allocation5 + $0x658] sm:$0xff] }
  0x6d   :  { %1000 = vmatpush.msra.mxu2 %v657_v30  ;;  %1019 = vmatpush.msra.mxu3 %v674_v31  ;;  %v1369_v36 = vmul.f32 0.0625, %v302_v4  ;;  %v293_v17 = vadd.f32 %v292_v11, %v291_v61  ;;  %v305_v20 = vadd.f32 %v304_v15, %v303_v3  ;;  %v748_v33 = vld [vmem:[#allocation5 + $0x7e8] sm:$0xff]  ;;  %v94_v40 = vld [vmem:[#allocation2 + $0x160] sm:$0xff]  ;;  %v198_v42 = vadd.f32 %v78_v35, %v62_v34  ;;  %v65_v34 = vld [vmem:[#allocation2 + $0x78] sm:$0xff] }
  0x6e   :  { %961 = vmatpush.msra.mxu0 %v624_v37  ;;  %980 = vmatpush.msra.mxu1 %v641_v38  ;;  %v182_v6 = vrot.slane %v181_v13, 1  ;;  %v195_v19 = vadd.f32 %v194_v14, %v193_v2  ;;  %v409_v37 = vrot.slane %v1367_v5, 4  ;;  %v110_v41 = vld [vmem:[#allocation2 + $0x1e0] sm:$0xff]  ;;  %v730_v2 = vld [vmem:[#allocation5 + $0x758] sm:$0xff]  ;;  %v79_v14 = vld [vmem:[#allocation2 + $0xe8] sm:$0xff] }
  0x6f   :  { %1001 = vmatpush.msra.mxu2 %v656_v39  ;;  %1020 = vmatpush.msra.mxu3 %v673_v8  ;;  %v765_v23 = vsel %vm458_vm0, %v1369_v36, %v1367_v5  ;;  %v294_v25 = vrot.slane %v293_v17, 1  ;;  %v306_v31 = vrot.slane %v305_v20, 2  ;;  %v421_v38 = vrot.slane %v1369_v36, 4  ;;  %v64_v8 = vld [vmem:[#allocation2 + $0x70] sm:$0xff]  ;;  %v747_v3 = vld [vmem:[#allocation5 + $0x7e0] sm:$0xff]  ;;  %v81_v35 = vld [vmem:[#allocation2 + $0xf8] sm:$0xff] }
  0x70   :  { %962 = vmatpush.msra.mxu0 %v623_v49  ;;  %981 = vmatpush.msra.mxu1 %v640_v50  ;;  %v183_v29 = vadd.f32 %v182_v6, %v181_v13  ;;  %v196_v30 = vrot.slane %v195_v19, 1  ;;  %v310_v47 = vadd.f32 %v110_v41, %v94_v40  ;;  %v96_v49 = vld [vmem:[#allocation2 + $0x170] sm:$0xff]  ;;  %v212_v60 = vadd.f32 %v80_v48, %v64_v8  ;;  %v63_v13 = vld [vmem:[#allocation2 + $0x68] sm:$0xff] }
  0x71   :  { %1002 = vmatpush.msra.mxu2 %v655_v57  ;;  %1021 = vmatpush.msra.mxu3 %v672_v59  ;;  %v295_v39 = vadd.f32 %v294_v25, %v293_v17  ;;  %v307_v46 = vadd.f32 %v306_v31, %v305_v20  ;;  %v112_v50 = vld [vmem:[#allocation2 + $0x1f0] sm:$0xff]  ;;  %v715_v57 = vld [vmem:[#allocation5 + $0x6e0] sm:$0xff]  ;;  %v199_v59 = vrot.slane %v198_v42, 4  ;;  %v696_v20 = vld [vmem:[#allocation5 + $0x648] sm:$0xff] }
  0x72   :  { %963 = vmatmul.f32.vlgmr.msra.gmra.mxu0 %v763_v62  ;;  %982 = vmatpush.msra.mxu1 %v639_v9  ;;  %v347_v44 = vmul.f32 0.0625, %v183_v29  ;;  %v197_v45 = vadd.f32 %v196_v30, %v195_v19  ;;  %v324_v61 = vadd.f32 %v112_v50, %v96_v49  ;;  %v311_v4 = vrot.slane %v310_v47, 4  ;;  %v697_v9 = vld [vmem:[#allocation5 + $0x650] sm:$0xff]  ;;  %v746_v19 = vld [vmem:[#allocation5 + $0x7d8] sm:$0xff]  ;;  %v111_v29 = vld [vmem:[#allocation2 + $0x1e8] sm:$0xff] }
  0x73   :  { %1067 = vmatpush.msrb.mxu2 %v734_v0  ;;  %1027 = vmatpush.msrb.mxu0 %v702_v7  ;;  %v363_v53 = vmul.f32 0.0625, %v295_v39  ;;  %v308_v0 = vrot.slane %v307_v46, 1  ;;  %v200_v11 = vadd.f32 %v199_v59, %v198_v42  ;;  %v205_v30 = vadd.f32 %v79_v14, %v63_v13  ;;  %v745_v31 = vld [vmem:[#allocation5 + $0x7d0] sm:$0xff]  ;;  %v712_v41 = vld [vmem:[#allocation5 + $0x6c8] sm:$0xff] }
  0x74   :  { %1022 = vmatpush.msra.mxu3 %v671_v12  ;;  %1047 = vmatpush.msrb.mxu1 %v718_v16  ;;  %v408_v62 = vrot.slane %v347_v44, 6  ;;  %v349_v1 = vmul.f32 0.0625, %v197_v45  ;;  %v213_v12 = vrot.slane %v212_v60, 4  ;;  %v744_v45 = vld [vmem:[#allocation5 + $0x7c8] sm:$0xff] }
  0x75   :  { %1003 = vmatmul.f32.vlgmr.msra.gmra.mxu2 %v765_v23  ;;  %1028 = vmatpush.msrb.mxu0 %v701_v63  ;;  %v420_v5 = vrot.slane %v363_v53, 6  ;;  %v764_v7 = vsel %vm458_vm0, %v363_v53, %v347_v44  ;;  %v309_v16 = vadd.f32 %v308_v0, %v307_v46  ;;  %v714_v63 = vld [vmem:[#allocation5 + $0x6d8] sm:$0xff]  ;;  %v325_v23 = vrot.slane %v324_v61, 4  ;;  %v727_v44 = vld [vmem:[#allocation5 + $0x740] sm:$0xff]  ;;  %v693_v0 = vld [vmem:[#allocation5 + $0x630] sm:$0xff] }
  0x76   :  { %1068 = vmatpush.msrb.mxu2 %v733_v18  ;;  %1087 = vmatpush.msrb.mxu3 %v750_v56  ;;  %v435_v15 = vsel %vm426_vm1, %v1356_v51, %v408_v62  ;;  %v410_v17 = vrot.slane %v349_v1, 2  ;;  %v729_v18 = vld [vmem:[#allocation5 + $0x750] sm:$0xff]  ;;  %v312_v56 = vadd.f32 %v311_v4, %v310_v47  ;;  %v206_v8 = vrot.slane %v205_v30, 4  ;;  %v694_v53 = vld [vmem:[#allocation5 + $0x638] sm:$0xff]  ;;  %v743_v62 = vld [vmem:[#allocation5 + $0x7c0] sm:$0xff] }
  0x77   :  { %1029 = vmatpush.msrb.mxu0 %v700_v21  ;;  %1048 = vmatpush.msrb.mxu1 %v717_v22  ;;  %v447_v6 = vsel %vm426_vm1, %v1358_v52, %v420_v5  ;;  %v713_v21 = vld [vmem:[#allocation5 + $0x6d0] sm:$0xff]  ;;  %v201_v22 = vrot.slane %v200_v11, 2  ;;  %v365_v25 = vmul.f32 0.0625, %v309_v16  ;;  %v97_v5 = vld [vmem:[#allocation2 + $0x178] sm:$0xff]  ;;  %v692_v16 = vld [vmem:[#allocation5 + $0x628] sm:$0xff] }
  0x78   :  { %1069 = vmatpush.msrb.mxu2 %v732_v58  ;;  %1088 = vmatpush.msrb.mxu3 %v749_v26  ;;  %v214_v58 = vadd.f32 %v213_v12, %v212_v60  ;;  %v436_v51 = vsel %vm428_vm2, %v409_v37, %v410_v17  ;;  %v728_v26 = vld [vmem:[#allocation5 + $0x748] sm:$0xff]  ;;  %v695_v37 = vld [vmem:[#allocation5 + $0x640] sm:$0xff]  ;;  %v207_v59 = vadd.f32 %v206_v8, %v205_v30  ;;  %v709_v17 = vld [vmem:[#allocation5 + $0x6b0] sm:$0xff] }
  0x79   :  { %1030 = vmatpush.msrb.mxu0 %v699_v27  ;;  %1049 = vmatpush.msrb.mxu1 %v716_v28  ;;  %v313_v27 = vrot.slane %v312_v56, 2  ;;  %v95_v28 = vld [vmem:[#allocation2 + $0x168] sm:$0xff]  ;;  %v437_v52 = vsel %vm430_vm3, %v435_v15, %v436_v51  ;;  %v422_v39 = vrot.slane %v365_v25, 2  ;;  %v766_v40 = vsel %vm458_vm0, %v365_v25, %v349_v1  ;;  %v710_v1 = vld [vmem:[#allocation5 + $0x6b8] sm:$0xff] }
  0x7a   :  { %1070 = vmatpush.msrb.mxu2 %v731_v32  ;;  %1089 = vmatpush.msrb.mxu3 %v748_v33  ;;  %v215_v32 = vrot.slane %v214_v58, 2  ;;  %v326_v33 = vadd.f32 %v325_v23, %v324_v61  ;;  %v202_v42 = vadd.f32 %v201_v22, %v200_v11  ;;  %v317_v49 = vadd.f32 %v111_v29, %v95_v28  ;;  %v742_v11 = vld [vmem:[#allocation5 + $0x7b8] sm:$0xff]  ;;  %v691_v22 = vld [vmem:[#allocation5 + $0x620] sm:$0xff] }
  0x7b   :  { %983 = vmatmul.f32.vlgmr.msra.gmra.mxu1 %v764_v7  ;;  %1031 = vmatpush.msrb.mxu0 %v698_v54  ;;  %v314_v46 = vadd.f32 %v313_v27, %v312_v56  ;;  %v448_v50 = vsel %vm428_vm2, %v421_v38, %v422_v39  ;;  %v711_v54 = vld [vmem:[#allocation5 + $0x6c0] sm:$0xff]  ;;  %v219_v60 = vadd.f32 %v81_v35, %v65_v34  ;;  %v208_v38 = vrot.slane %v207_v59, 2  ;;  %v113_v7 = vld [vmem:[#allocation2 + $0x1f8] sm:$0xff]  ;;  %v740_v27 = vld [vmem:[#allocation5 + $0x7a8] sm:$0xff] }
  0x7c   :  { %1050 = vmatpush.msrb.mxu1 %v715_v57  ;;  %1071 = vmatpush.msrb.mxu2 %v730_v2  ;;  %v216_v47 = vadd.f32 %v215_v32, %v214_v58  ;;  %v327_v48 = vrot.slane %v326_v33, 2  ;;  %v726_v57 = vld [vmem:[#allocation5 + $0x738] sm:$0xff]  ;;  %v449_v61 = vsel %vm430_vm3, %v447_v6, %v448_v50  ;;  %v203_v36 = vrot.slane %v202_v42, 1  ;;  %v724_v6 = vld [vmem:[#allocation5 + $0x728] sm:$0xff]  ;;  %v707_v32 = vld [vmem:[#allocation5 + $0x6a0] sm:$0xff] }
  0x7d   :  { %1090 = vmatpush.msrb.mxu3 %v747_v3  ;;  %1032 = vmatpush.msrb.mxu0 %v697_v9  ;;  %v1388_v3 = vrot.slane %v449_v61, 7  ;;  %v318_v4 = vrot.slane %v317_v49, 4  ;;  %v725_v9 = vld [vmem:[#allocation5 + $0x730] sm:$0xff]  ;;  %v315_v12 = vrot.slane %v314_v46, 1  ;;  %v220_v14 = vrot.slane %v219_v60, 4  ;;  %v708_v58 = vld [vmem:[#allocation5 + $0x6a8] sm:$0xff] }
  0x7e   :  { %1051 = vmatpush.msrb.mxu1 %v714_v63  ;;  %1072 = vmatpush.msrb.mxu2 %v729_v18  ;;  %v328_v2 = vadd.f32 %v327_v48, %v326_v33  ;;  %v217_v13 = vrot.slane %v216_v47, 1  ;;  %v209_v18 = vadd.f32 %v208_v38, %v207_v59  ;;  %v204_v23 = vadd.f32 %v203_v36, %v202_v42  ;;  %v722_v39 = vld [vmem:[#allocation5 + $0x718] sm:$0xff]  ;;  %v689_v42 = vld [vmem:[#allocation5 + $0x610] sm:$0xff]  ;;  %v687_v38 = vld [vmem:[#allocation5 + $0x600] sm:$0xff] }
  0x7f   :  { %1091 = vmatpush.msrb.mxu3 %v746_v19  ;;  %1033 = vmatpush.msrb.mxu0 %v696_v20  ;;  %v1392_v15 = vsel %vm458_vm0, %v1388_v3, %v437_v52  ;;  %v319_v56 = vadd.f32 %v318_v4, %v317_v49  ;;  %v741_v19 = vld [vmem:[#allocation5 + $0x7b0] sm:$0xff]  ;;  %v221_v20 = vadd.f32 %v220_v14, %v219_v60  ;;  %v706_v8 = vld [vmem:[#allocation5 + $0x698] sm:$0xff]  ;;  %v704_v4 = vld [vmem:[#allocation5 + $0x688] sm:$0xff] }
  0x80   :  { %1023 = vmatmul.f32.vlgmr.msra.gmra.mxu3 %v766_v40  ;;  %1052 = vmatpush.msrb.mxu1 %v713_v21  ;;  %v329_v63 = vrot.slane %v328_v2, 1  ;;  %v331_v21 = vadd.f32 %v113_v7, %v97_v5  ;;  %v210_v25 = vrot.slane %v209_v18, 1  ;;  %v316_v28 = vadd.f32 %v315_v12, %v314_v46  ;;  %v739_v40 = vld [vmem:[#allocation5 + $0x7a0] sm:$0xff]  ;;  %v721_v46 = vld [vmem:[#allocation5 + $0x710] sm:$0xff] }
  0x81   :  { %1073 = vmatpush.msrb.mxu2 %v728_v26  ;;  %1092 = vmatpush.msrb.mxu3 %v745_v31  ;;  %v320_v51 = vrot.slane %v319_v56, 2  ;;  %v723_v26 = vld [vmem:[#allocation5 + $0x720] sm:$0xff]  ;;  %v218_v29 = vadd.f32 %v217_v13, %v216_v47  ;;  %v222_v30 = vrot.slane %v221_v20, 2  ;;  %v690_v31 = vld [vmem:[#allocation5 + $0x618] sm:$0xff]  ;;  %v350_v48 = vmul.f32 0.0625, %v204_v23 }
  0x82   :  { %1034 = vmatpush.msrb.mxu0 %v695_v37  ;;  %1053 = vmatpush.msrb.mxu1 %v712_v41  ;;  %v332_v52 = vrot.slane %v331_v21, 4  ;;  %v330_v33 = vadd.f32 %v329_v63, %v328_v2  ;;  %v211_v34 = vadd.f32 %v210_v25, %v209_v18  ;;  %v738_v47 = vld [vmem:[#allocation5 + $0x798] sm:$0xff]  ;;  %v366_v49 = vmul.f32 0.0625, %v316_v28  ;;  %v703_v18 = vld [vmem:[#allocation5 + $0x680] sm:$0xff] }
  0x83   :  { %1074 = vmatpush.msrb.mxu2 %v727_v44  ;;  %1093 = vmatpush.msrb.mxu3 %v744_v45  ;;  %v321_v35 = vadd.f32 %v320_v51, %v319_v56  ;;  %v223_v37 = vadd.f32 %v222_v30, %v221_v20  ;;  %v352_v59 = vmul.f32 0.0625, %v218_v29  ;;  %v735_v56 = vld [vmem:[#allocation5 + $0x780] sm:$0xff] }
  0x84   :  { %1035 = vmatpush.msrb.mxu0 %v694_v53  ;;  %1054 = vmatpush.msrb.mxu1 %v711_v54  ;;  %v333_v41 = vadd.f32 %v332_v52, %v331_v21  ;;  %v351_v45 = vmul.f32 0.0625, %v211_v34  ;;  %v688_v54 = vld [vmem:[#allocation5 + $0x608] sm:$0xff]  ;;  %v368_v60 = vmul.f32 0.0625, %v330_v33  ;;  %v1149_v52 = vld [vmem:[%s1428_s2] ss:$0 sm:$0xff]  ;;  %s1259_s2 = smov [#allocation7]  }
  0x85   :  { %1075 = vmatpush.msrb.mxu2 %v726_v57  ;;  %1094 = vmatpush.msrb.mxu3 %v743_v62  ;;  %v322_v44 = vrot.slane %v321_v35, 1  ;;  %v224_v50 = vrot.slane %v223_v37, 1  ;;  %v705_v57 = vld [vmem:[#allocation5 + $0x690] sm:$0xff]  ;;  %v412_v12 = vrot.slane %v352_v59, 4  ;;  %s1113_s28 = sshll.u32 %s1259_s2, 4  ;;  %s1114_s28 = int_to_ptr.vmem [resolvable:$true] %s1113_s28 }
  0x86   :  { %1036 = vmatpush.msrb.mxu0 %v693_v0  ;;  %1055 = vmatpush.msrb.mxu1 %v710_v1  ;;  %v334_v53 = vrot.slane %v333_v41, 2  ;;  %v411_v62 = vrot.slane %v351_v45, 6  ;;  %v720_v0 = vld [vmem:[#allocation5 + $0x708] sm:$0xff]  ;;  %v737_v1 = vld [vmem:[#allocation5 + $0x790] sm:$0xff] }
  0x87   :  { %1076 = vmatpush.msrb.mxu2 %v725_v9  ;;  %1095 = vmatpush.msrb.mxu3 %v742_v11  ;;  %v323_v61 = vadd.f32 %v322_v44, %v321_v35  ;;  %v225_v2 = vadd.f32 %v224_v50, %v223_v37  ;;  %v719_v9 = vld [vmem:[#allocation5 + $0x700] sm:$0xff]  ;;  %v736_v11 = vld [vmem:[#allocation5 + $0x788] sm:$0xff] }
  0x88   :  { %1037 = vmatpush.msrb.mxu0 %v692_v16  ;;  %1056 = vmatpush.msrb.mxu1 %v709_v17  ;;  %v335_v36 = vadd.f32 %v334_v53, %v333_v41  ;;  %v438_v7 = vsel %vm426_vm1, %v350_v48, %v411_v62  ;;  %v767_v16 = vsel %vm458_vm0, %v366_v49, %v350_v48 }
  0x89   :  { %1077 = vmatpush.msrb.mxu2 %v724_v6  ;;  %1096 = vmatpush.msrb.mxu3 %v741_v19  ;;  %v367_v5 = vmul.f32 0.0625, %v323_v61  ;;  %v353_v14 = vmul.f32 0.0625, %v225_v2  ;;  %v769_v17 = vsel %vm458_vm0, %v368_v60, %v352_v59  ;;  %v470_v48 = vsel %vm460_vm4, %v1354_v43, %v1362_v55 }
  0x8a   :  { %1038 = vmatpush.msrb.mxu0 %v691_v22  ;;  %1057 = vmatpush.msrb.mxu1 %v708_v58  ;;  %v336_v13 = vrot.slane %v335_v36, 1  ;;  %v424_v22 = vrot.slane %v368_v60, 4 }
  0x8b   :  { %1078 = vmatpush.msrb.mxu2 %v723_v26  ;;  %1097 = vmatpush.msrb.mxu3 %v740_v27  ;;  %v423_v63 = vrot.slane %v367_v5, 6  ;;  %v413_v19 = vrot.slane %v353_v14, 2  ;;  %v768_v21 = vsel %vm458_vm0, %v367_v5, %v351_v45 }
  0x8c   :  { %1039 = vmatpush.msrb.mxu0 %v690_v31  ;;  %1058 = vmatpush.msrb.mxu1 %v707_v32  ;;  %v337_v6 = vadd.f32 %v336_v13, %v335_v36 }
  0x8d   :  { %1079 = vmatpush.msrb.mxu2 %v722_v39  ;;  %1098 = vmatpush.msrb.mxu3 %v739_v40  ;;  %v450_v20 = vsel %vm426_vm1, %v366_v49, %v423_v63  ;;  %v439_v23 = vsel %vm428_vm2, %v412_v12, %v413_v19  ;;  %v477_v49 = vsel %vm460_vm4, %v1388_v3, %v1392_v15 }
  0x8e   :  { %1040 = vmatpush.msrb.mxu0 %v689_v42  ;;  %1059 = vmatpush.msrb.mxu1 %v706_v8  ;;  %v369_v58 = vmul.f32 0.0625, %v337_v6  ;;  %v440_v25 = vsel %vm430_vm3, %v438_v7, %v439_v23 }
  0x8f   :  { %1080 = vmatpush.msrb.mxu2 %v721_v46  ;;  %1099 = vmatpush.msrb.mxu3 %v738_v47  ;;  %v461_v47 = vsel %vm460_vm4, %v1318_v10, %v1322_v24 }
  0x90   :  { %1041 = vmatpush.msrb.mxu0 %v688_v54  ;;  %1060 = vmatpush.msrb.mxu1 %v705_v57  ;;  %v425_v51 = vrot.slane %v369_v58, 2  ;;  %v770_v26 = vsel %vm458_vm0, %v369_v58, %v353_v14  ;;  %v463_v53 = vsel %vm462_vm5, %v1318_v10, %v461_v47  ;;  %v471_v54 = vsel %vm462_vm5, %v1354_v43, %v470_v48 }
  0x91   :  { %1081 = vmatpush.msrb.mxu2 %v720_v0  ;;  %1100 = vmatpush.msrb.mxu3 %v737_v1  ;;  %v478_v57 = vsel %vm462_vm5, %v1388_v3, %v477_v49  ;;  %v465_v24 = vsel %vm464_vm6, %v1318_v10, %v463_v53  ;;  %v472_v55 = vsel %vm464_vm6, %v1354_v43, %v471_v54 }
  0x92   :  { %1042 = vmatpush.msrb.mxu0 %v687_v38  ;;  %1061 = vmatpush.msrb.mxu1 %v704_v4  ;;  %v451_v27 = vsel %vm428_vm2, %v424_v22, %v425_v51  ;;  %v479_v15 = vsel %vm464_vm6, %v1388_v3, %v478_v57  ;;  %491 = vst [vmem:[#allocation7] sm:$0xff] %v465_v24 }
  0x93   :  { %1082 = vmatpush.msrb.mxu2 %v719_v9  ;;  %1101 = vmatpush.msrb.mxu3 %v736_v11  ;;  %v452_v28 = vsel %vm430_vm3, %v450_v20, %v451_v27  ;;  %492 = vst [vmem:[#allocation7 + $0x8] sm:$0xff] %v472_v55 }
  0x94   :  { %1043 = vmatmul.f32.vlgmr.msrb.gmra.mxu0 %v767_v16  ;;  %1083 = vmatmul.f32.vlgmr.msrb.gmra.mxu2 %v769_v17  ;;  %v482_v29 = vrot.slane %v452_v28, 7  ;;  %493 = vst [vmem:[#allocation7 + $0x10] sm:$0xff] %v479_v15 }
  0x95   :  { %1062 = vmatpush.msrb.mxu1 %v703_v18  ;;  %1102 = vmatpush.msrb.mxu3 %v735_v56 }
  0x96   :  { %1063 = vmatmul.f32.vlgmr.msrb.gmra.mxu1 %v768_v21  ;;  %1103 = vmatmul.f32.vlgmr.msrb.gmra.mxu3 %v770_v26  ;;  %v483_v30 = vsel %vm458_vm0, %v482_v29, %v440_v25 }
  0x97   :  { %v484_v50 = vsel %vm460_vm4, %v482_v29, %v483_v30 }
  0x98   :  { %v485_v59 = vsel %vm462_vm5, %v482_v29, %v484_v50 }
  0x99   :  { %v486_v60 = vsel %vm464_vm6, %v482_v29, %v485_v59 }
  0x9a   :  { %494 = vst [vmem:[#allocation7 + $0x18] sm:$0xff] %v486_v60 }
  0x9b   :  { %1118 = dma.vmem_to_hbm [thread:$0]  %s1114_s28, 512, %s1116_s5, [#allocation4]  }
  0xcb   :  { %v804_v31 = vpop.f32.mrf.mxu0 }
  0xcc   :  { %v805_v32 = vadd.f32 %v1149_v52, %v804_v31 }
  0xce   :  { %v824_v33 = vpop.f32.mrf.mxu1 }
  0xcf   :  { %v825_v34 = vadd.f32 %v824_v33, %v805_v32 }
  0xd1   :  { %v844_v35 = vpop.f32.mrf.mxu2 }
  0xd2   :  { %v845_v39 = vadd.f32 %v844_v35, %v825_v34 }
  0xd4   :  { %v864_v40 = vpop.f32.mrf.mxu3 }
  0xd5   :  { %v865_v37 = vadd.f32 %v864_v40, %v845_v39 }
  0xdd   :  { %v884_v41 = vpop.f32.mrf.mxu0 }
  0xde   :  { %v885_v42 = vadd.f32 %v884_v41, %v865_v37 }
  0xe1   :  { %v924_v45 = vpop.f32.mrf.mxu2 }
  0xe6   :  { %v904_v8 = vpop.f32.mrf.mxu1 }
  0xe7   :  { %v905_v44 = vadd.f32 %v904_v8, %v885_v42 }
  0xe8   :  { %v944_v61 = vpop.f32.mrf.mxu3 }
  0xe9   :  { %v925_v46 = vadd.f32 %v924_v45, %v905_v44 }
  0xeb   :  { %v945_v0 = vadd.f32 %v944_v61, %v925_v46 }
  0xef   :  { %v964_v62 = vpop.f32.mrf.mxu0 }
  0xf0   :  { %v965_v1 = vadd.f32 %v964_v62, %v945_v0 }
  0xf8   :  { %v984_v2 = vpop.f32.mrf.mxu1  ;;  %v1004_v36 = vpop.f32.mrf.mxu2 }
  0xf9   :  { %v985_v38 = vadd.f32 %v984_v2, %v965_v1 }
  0xfb   :  { %v1005_v10 = vadd.f32 %v1004_v36, %v985_v38 }
 0x103   :  { %v1024_v4 = vpop.f32.mrf.mxu3 }
 0x104   :  { %v1025_v43 = vadd.f32 %v1024_v4, %v1005_v10 }
 0x111   :  { %v1044_v5 = vpop.f32.mrf.mxu0 }
 0x112   :  { %v1045_v3 = vadd.f32 %v1044_v5, %v1025_v43 }
 0x113   :  { %v1064_v7 = vpop.f32.mrf.mxu1 }
 0x114   :  { %v1065_v9 = vadd.f32 %v1064_v7, %v1045_v3 }
 0x117   :  { %v1084_v11 = vpop.f32.mrf.mxu2 }
 0x118   :  { %v1085_v12 = vadd.f32 %v1084_v11, %v1065_v9 }
 0x119   :  { %v1104_v13 = vpop.f32.mrf.mxu3 }
 0x11a   :  { %v1105_v14 = vadd.f32 %v1104_v13, %v1085_v12 }
 0x11c   :  { %1107 = vst [vmem:[#allocation8] sm:$0x3] %v1105_v14 }
 0x11d   :  { %1129 = dma.vmem_to_hbm [thread:$0]  %s1125_s6, 32, %s1127_s9, [#allocation9]  }
 0x11e   :  { %1250 = dma.done.wait [#allocation4], 512  }
 0x11f   :  { %1251 = vsyncadd [#allocation4], 4294966784 }
 0x120   :  { %1252 = dma.done.wait [#allocation9], 32  }
 0x121   :  { %1253 = vsyncadd [#allocation9], 4294967264 }
 0x122   :  { %1138 = vsyncpa [#allocation3], 1 }
 0x123   :  { %1139 = vsyncpa [#allocation6], 1 }
 0x124   :  { %1140 = vsyncpa [#allocation4], 1 }
 0x125   :  { %1141 = vsyncpa [#allocation9], 1 }

</bundles_post_ra>
